<compile_context>
chip_gen: v7x
topology: tpu7x:2x2x1
jax: 0.10.0
libtpu: 0.0.40
codegen_flags: <defaults>
</compile_context>

<pallas_src>
import functools

import jax
import jax.numpy as jnp
from jax.experimental import pallas as pl
from jax.experimental.pallas import tpu as pltpu


_LN_EPS = 1e-5
_LINEAR_TILE_M = 512          # token tile for standalone linear kernels
_MLP_TOKEN_TILE = 256         # inner token tile for the fused-layer MLP
_LAYER_VMEM_LIMIT = 48 * 1024 * 1024   # < 64 MiB physical on v7x, fine on v5e/v6e


# ----------------------------------------------------------------------------
# Optional single-buffering of grid-invariant (weight) operands
# ----------------------------------------------------------------------------
def _probe_weight_pipeline_mode():
    """Detect whether this Pallas build honors pipeline_mode=pl.Buffered(1) on
    pallas_call BlockSpecs.  Falls back to default (double-buffered) specs."""
    try:
        mode = pl.Buffered(1)
    except Exception:
        return None

    def _k(x_ref, w_ref, o_ref):
        o_ref[...] = jnp.dot(x_ref[...].astype(w_ref.dtype), w_ref[...],
                             preferred_element_type=jnp.float32)

    try:
        x = jnp.zeros((8, 128), jnp.float32)
        w = jnp.zeros((128, 128), jnp.bfloat16)
        out = pl.pallas_call(
            _k,
            out_shape=jax.ShapeDtypeStruct((8, 128), jnp.float32),
            grid=(1,),
            in_specs=[
                pl.BlockSpec((8, 128), lambda i: (0, 0)),
                pl.BlockSpec((128, 128), lambda i: (0, 0), pipeline_mode=mode),
            ],
            out_specs=pl.BlockSpec((8, 128), lambda i: (0, 0)),
        )(x, w)
        jax.block_until_ready(out)
        return mode
    except Exception:
        return None


_WEIGHT_PIPELINE_MODE = _probe_weight_pipeline_mode()


def _const_spec(shape):
    """BlockSpec for a grid-invariant operand (constant index_map); single
    buffered when supported so weights are not needlessly double-buffered."""
    index_map = lambda *_: tuple(0 for _ in shape)
    if _WEIGHT_PIPELINE_MODE is not None:
        return pl.BlockSpec(shape, index_map, pipeline_mode=_WEIGHT_PIPELINE_MODE)
    return pl.BlockSpec(shape, index_map)


# ----------------------------------------------------------------------------
# In-kernel helpers
# ----------------------------------------------------------------------------
def _choose_tile_m(M, target=_LINEAR_TILE_M):
    """Token-axis tile: full M when it fits, else an 8-aligned target tile."""
    if M <= target:
        return M
    return max((target // 8) * 8, 8)


def _erf(x):
    # Abramowitz & Stegun 7.1.26 rational approximation (|err| <= 1.5e-7),
    # built from exp / mul / add / where only so it always lowers in Mosaic.
    a1, a2, a3, a4, a5 = (0.254829592, -0.284496736, 1.421413741,
                          -1.453152027, 1.061405429)
    p = 0.3275911
    sgn = jnp.where(x >= 0.0, 1.0, -1.0)
    ax = jnp.abs(x)
    t = 1.0 / (1.0 + p * ax)
    poly = t * (a1 + t * (a2 + t * (a3 + t * (a4 + t * a5))))
    return sgn * (1.0 - poly * jnp.exp(-ax * ax))


def _gelu(x):
    # Exact (erf-based) GELU matching torch.nn.GELU(); error is ~1e-7.
    return 0.5 * x * (1.0 + _erf(x * 0.7071067811865475))


def _layernorm(x, g, b, eps):
    mu = jnp.mean(x, axis=-1, keepdims=True)
    var = jnp.mean(jnp.square(x - mu), axis=-1, keepdims=True)  # biased, like torch
    return (x - mu) * jax.lax.rsqrt(var + eps) * g + b


# ----------------------------------------------------------------------------
# Standalone linear kernels (patch embedding, classifier head)
# ----------------------------------------------------------------------------
def _linear_kernel(x_ref, w_ref, b_ref, o_ref):
    # (TM, K) @ (K, N) + (1, N) -> (TM, N); bf16 MXU operands, f32 accumulate.
    x = x_ref[...].astype(w_ref.dtype)
    o_ref[...] = (
        jnp.dot(x, w_ref[...], preferred_element_type=jnp.float32) + b_ref[...]
    )


def linear(x, w, b, *, tile_m=_LINEAR_TILE_M):
    """x: (M, K) f32, w: (K, N) bf16, b: (N,) f32 -> (M, N) f32."""
    M, K = x.shape
    N = w.shape[1]
    tm = _choose_tile_m(M, tile_m)
    return pl.pallas_call(
        _linear_kernel,
        out_shape=jax.ShapeDtypeStruct((M, N), jnp.float32),
        grid=(pl.cdiv(M, tm),),
        in_specs=[
            pl.BlockSpec((tm, K), lambda i: (i, 0)),
            _const_spec((K, N)),            # weight stays VMEM-resident
            _const_spec((1, N)),
        ],
        out_specs=pl.BlockSpec((tm, N), lambda i: (i, 0)),
        compiler_params=pltpu.CompilerParams(dimension_semantics=("parallel",)),
    )(x, w, b.reshape(1, N))


def _ln_linear_kernel(x_ref, g_ref, bt_ref, w_ref, b_ref, o_ref, *, eps):
    # Fused LayerNorm + Linear (classifier head).
    y = _layernorm(x_ref[...], g_ref[...], bt_ref[...], eps)
    o_ref[...] = (
        jnp.dot(y.astype(w_ref.dtype), w_ref[...],
                preferred_element_type=jnp.float32) + b_ref[...]
    )


def ln_linear(x, g, bt, w, b, *, eps=_LN_EPS, tile_m=_LINEAR_TILE_M):
    """x: (M, D) f32 -> LayerNorm -> @ w (D, N) bf16 + b -> (M, N) f32."""
    M, D = x.shape
    N = w.shape[1]
    tm = _choose_tile_m(M, tile_m)
    return pl.pallas_call(
        functools.partial(_ln_linear_kernel, eps=eps),
        out_shape=jax.ShapeDtypeStruct((M, N), jnp.float32),
        grid=(pl.cdiv(M, tm),),
        in_specs=[
            pl.BlockSpec((tm, D), lambda i: (i, 0)),
            _const_spec((1, D)),
            _const_spec((1, D)),
            _const_spec((D, N)),
            _const_spec((1, N)),
        ],
        out_specs=pl.BlockSpec((tm, N), lambda i: (i, 0)),
        compiler_params=pltpu.CompilerParams(dimension_semantics=("parallel",)),
    )(x, g.reshape(1, D), bt.reshape(1, D), w, b.reshape(1, N))


# ----------------------------------------------------------------------------
# Fused transformer layer kernel (attention + MLP, residual stays in VMEM)
# ----------------------------------------------------------------------------
def _layer_kernel(h_ref, ln1g_ref, ln1b_ref, wqkv_ref, wproj_ref, bproj_ref,
                  ln2g_ref, ln2b_ref, w1_ref, b1_ref, w2_ref, b2_ref, o_ref,
                  *, eps, heads, dim_head):
    h = h_ref[0]                                            # (S, D) f32
    S = h.shape[0]
    inner = heads * dim_head

    # ---- attention: LN1 + ONE wide QKV matmul + per-head softmax + proj ----
    y = _layernorm(h, ln1g_ref[...], ln1b_ref[...], eps)
    y_lo = y.astype(wqkv_ref.dtype)                         # bf16 MXU operand
    # Single (S, D) @ (D, 3*inner) matmul saturates the MXU N dimension;
    # the 1/sqrt(dim_head) scale is already baked into the q columns.
    qkv = jnp.dot(y_lo, wqkv_ref[...],
                  preferred_element_type=jnp.float32)       # (S, 3*inner) f32
    head_outs = []
    for hd in range(heads):                                 # static unroll
        q = qkv[:, hd * dim_head:(hd + 1) * dim_head]
        k = qkv[:, inner + hd * dim_head:inner + (hd + 1) * dim_head]
        v = qkv[:, 2 * inner + hd * dim_head:2 * inner + (hd + 1) * dim_head]
        # scores = q @ k^T via contraction dims (no materialized transpose)
        s = jax.lax.dot_general(
            q.astype(wqkv_ref.dtype), k.astype(wqkv_ref.dtype),
            (((1,), (1,)), ((), ())),
            preferred_element_type=jnp.float32)             # (S, S) f32
        s = s - jnp.max(s, axis=-1, keepdims=True)
        p = jnp.exp(s)
        # EUP approx reciprocal frees VALU slots vs. a divide.
        p = p * pl.reciprocal(jnp.sum(p, axis=-1, keepdims=True), approx=True)
        head_outs.append(
            jnp.dot(p.astype(wqkv_ref.dtype), v.astype(wqkv_ref.dtype),
                    preferred_element_type=jnp.float32))    # (S, Dh)
    # Lane-concat heads and do ONE (S, inner) @ (inner, D) projection (full-K
    # MXU contraction; no live f32 accumulator across the head loop).
    o_cat = jnp.concatenate(head_outs, axis=-1)             # (S, inner)
    attn = jnp.dot(o_cat.astype(wproj_ref.dtype), wproj_ref[...],
                   preferred_element_type=jnp.float32) + bproj_ref[...]
    h = h + attn                                            # residual 1 (VMEM)

    # ---- MLP: LN2 + fc1 + GELU + fc2, token-tiled to bound (tile, Hm) ----
    mt = min(S, _MLP_TOKEN_TILE)
    for t0 in range(0, S, mt):                              # static unroll
        t1 = min(S, t0 + mt)
        ht = h[t0:t1]
        y2 = _layernorm(ht, ln2g_ref[...], ln2b_ref[...], eps)
        m = jnp.dot(y2.astype(w1_ref.dtype), w1_ref[...],
                    preferred_element_type=jnp.float32) + b1_ref[...]
        m = _gelu(m)                                        # exact GELU
        out = jnp.dot(m.astype(w2_ref.dtype), w2_ref[...],
                      preferred_element_type=jnp.float32) + b2_ref[...]
        o_ref[0, t0:t1, :] = ht + out                       # residual 2 fused


def transformer_layer(h, blk, *, heads, dim_head, eps=_LN_EPS):
    """h: (B, S, D) f32 -> full pre-norm transformer block (attn + MLP)."""
    B, S, D = h.shape
    inner = heads * dim_head
    Hm = blk["fc1_w"].shape[1]
    kernel = functools.partial(_layer_kernel, eps=eps, heads=heads,
                               dim_head=dim_head)
    # TODO(synk): on v7x with very small batch, split the grid over q-tiles as
    # well so both TensorCores stay busy; (B,) is enough for the shapes here.
    return pl.pallas_call(
        kernel,
        out_shape=jax.ShapeDtypeStruct((B, S, D), jnp.float32),
        grid=(B,),
        in_specs=[
            pl.BlockSpec((1, S, D), lambda b: (b, 0, 0)),
            _const_spec((1, D)),            # ln1 gamma
            _const_spec((1, D)),            # ln1 beta
            _const_spec((D, 3 * inner)),    # fused qkv weight (q cols pre-scaled)
            _const_spec((inner, D)),        # output projection weight
            _const_spec((1, D)),            # output projection bias
            _const_spec((1, D)),            # ln2 gamma
            _const_spec((1, D)),            # ln2 beta
            _const_spec((D, Hm)),           # fc1 weight
            _const_spec((1, Hm)),           # fc1 bias
            _const_spec((Hm, D)),           # fc2 weight
            _const_spec((1, D)),            # fc2 bias
        ],
        out_specs=pl.BlockSpec((1, S, D), lambda b: (b, 0, 0)),
        compiler_params=pltpu.CompilerParams(
            dimension_semantics=("parallel",),
            vmem_limit_bytes=_LAYER_VMEM_LIMIT),
    )(h,
      blk["ln1_g"].reshape(1, D), blk["ln1_b"].reshape(1, D),
      blk["qkv_w"], blk["proj_w"], blk["proj_b"].reshape(1, D),
      blk["ln2_g"].reshape(1, D), blk["ln2_b"].reshape(1, D),
      blk["fc1_w"], blk["fc1_b"].reshape(1, Hm),
      blk["fc2_w"], blk["fc2_b"].reshape(1, D))


# ----------------------------------------------------------------------------
# Model glue (plain JAX): patchify, token bookkeeping
# ----------------------------------------------------------------------------
def patchify(x, p):
    # 'b c (h p1) (w p2) -> b (h w) (p1 p2 c)'
    B, C, H, W = x.shape
    h, w = H // p, W // p
    x = x.reshape(B, C, h, p, w, p)
    x = x.transpose(0, 2, 4, 3, 5, 1)                       # (B, h, w, p1, p2, C)
    return x.reshape(B, h * w, p * p * C)


def init_params(key, *, patch_dim, dim, depth, heads, dim_head, dim_mlp,
                num_classes, num_patches):
    inner = heads * dim_head
    scale = dim_head ** -0.5
    keys = iter(jax.random.split(key, 8 + depth * 8))

    def w(shape):
        return (0.02 * jax.random.normal(next(keys), shape)).astype(jnp.float32)

    def bf(a):
        return a.astype(jnp.bfloat16)   # bf16 MXU operands, f32 accumulation

    # Classifier head weights are 128-lane padded ONCE here (hoisted out of the
    # forward pass) so the head kernel issues dense vst stores.
    n_pad = ((num_classes + 127) // 128) * 128
    head_w = jnp.pad(w((dim, num_classes)), ((0, 0), (0, n_pad - num_classes)))

    params = {
        "patch_w": bf(w((patch_dim, dim))),
        "patch_b": jnp.zeros((dim,), jnp.float32),
        "cls": w((1, 1, dim)),
        "pos": w((1, num_patches + 1, dim)),
        "head_ln_g": jnp.ones((dim,), jnp.float32),
        "head_ln_b": jnp.zeros((dim,), jnp.float32),
        "head_w": bf(head_w),                                # (dim, n_pad)
        "head_b": jnp.zeros((n_pad,), jnp.float32),
        "blocks": [],
    }
    for _ in range(depth):
        # torch to_qkv.weight.T is (dim, 3*inner) with columns ordered
        # (q|k|v) x head x dim_head.  Keep exactly that layout so the kernel
        # does ONE wide fused QKV matmul; bake the attention scale into the
        # q columns once at init (free at runtime).
        qkv_w = w((dim, 3 * inner))
        qkv_w = qkv_w.at[:, :inner].multiply(scale)
        params["blocks"].append({
            "ln1_g": jnp.ones((dim,), jnp.float32),
            "ln1_b": jnp.zeros((dim,), jnp.float32),
            "qkv_w": bf(qkv_w),                              # (D, 3*inner)
            "proj_w": bf(w((inner, dim))),                   # (inner, D)
            "proj_b": jnp.zeros((dim,), jnp.float32),
            "ln2_g": jnp.ones((dim,), jnp.float32),
            "ln2_b": jnp.zeros((dim,), jnp.float32),
            "fc1_w": bf(w((dim, dim_mlp))),
            "fc1_b": jnp.zeros((dim_mlp,), jnp.float32),
            "fc2_w": bf(w((dim_mlp, dim))),
            "fc2_b": jnp.zeros((dim,), jnp.float32),
        })
    return params


def vit_forward(params, x, *, patch_size, heads, dim_head, num_classes):
    B = x.shape[0]
    # --- embedding: PatchEmbedding -> CLSToken -> AbsPosEmbedding ---
    patches = patchify(x, patch_size)                        # (B, Np, patch_dim)
    _, Np, pd = patches.shape
    tok = linear(patches.reshape(B * Np, pd),
                 params["patch_w"], params["patch_b"])
    dim = tok.shape[-1]
    tok = tok.reshape(B, Np, dim)
    cls = jnp.broadcast_to(params["cls"], (B, 1, dim))
    h = jnp.concatenate([cls, tok], axis=1) + params["pos"]  # (B, S, dim)
    # Dropout / emb_dropout / stochastic depth are 0.0 -> identity (eval).

    # --- transformer blocks: ONE fused kernel per layer (attn + MLP) ---
    for blk in params["blocks"]:
        h = transformer_layer(h, blk, heads=heads, dim_head=dim_head)

    # --- classifier: x[:, 0] -> LayerNorm -> Linear (pre-padded to 128) ---
    cls_tok = h[:, 0]                                        # (B, dim)
    logits = ln_linear(cls_tok, params["head_ln_g"], params["head_ln_b"],
                       params["head_w"], params["head_b"])
    return logits[:, :num_classes]                           # (B, num_classes)


# ----------------------------------------------------------------------------
if __name__ == "__main__":
    # Small config consistent with the module's constructor.
    image_size, patch_size, channel = 16, 4, 3
    dim, heads, dim_head, dim_mlp = 32, 2, 16, 64
    depth, num_classes = 2, 10
    batch = 2

    num_patches = (image_size // patch_size) ** 2            # 16
    patch_dim = channel * patch_size * patch_size            # 48

    key = jax.random.PRNGKey(0)
    k_params, k_x = jax.random.split(key)
    params = init_params(
        k_params, patch_dim=patch_dim, dim=dim, depth=depth, heads=heads,
        dim_head=dim_head, dim_mlp=dim_mlp, num_classes=num_classes,
        num_patches=num_patches)

    x = jax.random.normal(k_x, (batch, channel, image_size, image_size),
                          dtype=jnp.float32)                 # NCHW like PyTorch

    fwd = jax.jit(functools.partial(
        vit_forward, patch_size=patch_size, heads=heads, dim_head=dim_head,
        num_classes=num_classes))
    logits = fwd(params, x)
    jax.block_until_ready(logits)
    assert logits.shape == (batch, num_classes)
    assert bool(jnp.all(jnp.isfinite(logits)))
    print("KERNEL_OK")
</pallas_src>

<mosaic_0001>
module attributes {stable_mosaic.version = 11 : i64} {
  func.func @_k(%arg0: i32, %arg1: memref<8x128xf32, #tpu.memory_space<vmem>>, %arg2: memref<128x128xbf16, #tpu.memory_space<vmem>>, %arg3: memref<8x128xf32, #tpu.memory_space<vmem>>) attributes {dimension_semantics = [#tpu.dimension_semantics<arbitrary>], iteration_bounds = array<i64: 1>, scalar_prefetch = 0 : i64, scratch_operands = 0 : i64, tpu.core_type = #tpu.core_type<tc>, window_params = [{pipeline_mode = #tpu.pipeline_mode<synchronous>, transform_indices = @transform_0, window_bounds = array<i64: 8, 128>}, {pipeline_mode = #tpu.pipeline_mode<synchronous>, transform_indices = @transform_1, window_bounds = array<i64: 128, 128>}, {pipeline_mode = #tpu.pipeline_mode<synchronous>, transform_indices = @transform_2, window_bounds = array<i64: 8, 128>}]} {
    %c0 = arith.constant 0 : index
    %c0_0 = arith.constant 0 : index
    %0 = vector.load %arg1[%c0, %c0_0] : memref<8x128xf32, #tpu.memory_space<vmem>>, vector<8x128xf32>
    %1 = arith.truncf %0 : vector<8x128xf32> to vector<8x128xbf16>
    %c0_1 = arith.constant 0 : index
    %c0_2 = arith.constant 0 : index
    %2 = vector.load %arg2[%c0_1, %c0_2] : memref<128x128xbf16, #tpu.memory_space<vmem>>, vector<128x128xbf16>
    %cst = arith.constant dense<0.000000e+00> : vector<8x128xf32>
    %3 = tpu.matmul %1, %2, %cst {dimension_numbers = #tpu.dot_dimension_numbers<[1], [0], [0], [1], [0, 0, 1, 1], [], []>} : vector<8x128xbf16>, vector<128x128xbf16>, vector<8x128xf32> -> vector<8x128xf32>
    %c0_3 = arith.constant 0 : index
    %c0_4 = arith.constant 0 : index
    %4 = vector.load %arg3[%c0_3, %c0_4] : memref<8x128xf32, #tpu.memory_space<vmem>>, vector<8x128xf32>
    tpu.vector_store %arg3[%c0_3, %c0_4], %3 {strides = array<i32>} : memref<8x128xf32, #tpu.memory_space<vmem>>, vector<8x128xf32>,
    return
  }
  func.func @transform_0(%arg0: i32) -> (i32, i32) {
    %c0_i32 = arith.constant 0 : i32
    %c0_i32_0 = arith.constant 0 : i32
    %c0_i32_1 = arith.constant 0 : i32
    return %c0_i32, %c0_i32_0 : i32, i32
  }
  func.func @transform_1(%arg0: i32) -> (i32, i32) {
    %c0_i32 = arith.constant 0 : i32
    %c0_i32_0 = arith.constant 0 : i32
    %c0_i32_1 = arith.constant 0 : i32
    return %c0_i32, %c0_i32_0 : i32, i32
  }
  func.func @transform_2(%arg0: i32) -> (i32, i32) {
    %c0_i32 = arith.constant 0 : i32
    %c0_i32_0 = arith.constant 0 : i32
    %c0_i32_1 = arith.constant 0 : i32
    return %c0_i32, %c0_i32_0 : i32, i32
  }
}

module attributes {stable_mosaic.version = 11 : i64} {
  func.func @_linear_kernel(%arg0: i32, %arg1: memref<32x48xf32, #tpu.memory_space<vmem>>, %arg2: memref<48x32xbf16, #tpu.memory_space<vmem>>, %arg3: memref<1x32xf32, #tpu.memory_space<vmem>>, %arg4: memref<32x32xf32, #tpu.memory_space<vmem>>) attributes {dimension_semantics = [#tpu.dimension_semantics<parallel>], iteration_bounds = array<i64: 1>, scalar_prefetch = 0 : i64, scratch_operands = 0 : i64, tpu.core_type = #tpu.core_type<tc>, window_params = [{transform_indices = @transform_0, window_bounds = array<i64: 32, 48>}, {pipeline_mode = #tpu.pipeline_mode<synchronous>, transform_indices = @transform_1, window_bounds = array<i64: 48, 32>}, {pipeline_mode = #tpu.pipeline_mode<synchronous>, transform_indices = @transform_2, window_bounds = array<i64: 1, 32>}, {transform_indices = @transform_3, window_bounds = array<i64: 32, 32>}]} {
    %c0 = arith.constant 0 : index
    %c0_0 = arith.constant 0 : index
    %0 = vector.load %arg1[%c0, %c0_0] : memref<32x48xf32, #tpu.memory_space<vmem>>, vector<32x48xf32>
    %1 = arith.truncf %0 : vector<32x48xf32> to vector<32x48xbf16>
    %c0_1 = arith.constant 0 : index
    %c0_2 = arith.constant 0 : index
    %2 = vector.load %arg2[%c0_1, %c0_2] : memref<48x32xbf16, #tpu.memory_space<vmem>>, vector<48x32xbf16>
    %cst = arith.constant dense<0.000000e+00> : vector<32x32xf32>
    %3 = tpu.matmul %1, %2, %cst {dimension_numbers = #tpu.dot_dimension_numbers<[1], [0], [0], [1], [0, 0, 1, 1], [], []>} : vector<32x48xbf16>, vector<48x32xbf16>, vector<32x32xf32> -> vector<32x32xf32>
    %c0_3 = arith.constant 0 : index
    %c0_4 = arith.constant 0 : index
    %4 = vector.load %arg3[%c0_3, %c0_4] : memref<1x32xf32, #tpu.memory_space<vmem>>, vector<1x32xf32>
    %5 = vector.broadcast %4 : vector<1x32xf32> to vector<32x32xf32>
    %6 = arith.addf %3, %5 : vector<32x32xf32>
    %c0_5 = arith.constant 0 : index
    %c0_6 = arith.constant 0 : index
    %7 = vector.load %arg4[%c0_5, %c0_6] : memref<32x32xf32, #tpu.memory_space<vmem>>, vector<32x32xf32>
    tpu.vector_store %arg4[%c0_5, %c0_6], %6 {strides = array<i32>} : memref<32x32xf32, #tpu.memory_space<vmem>>, vector<32x32xf32>,
    return
  }
  func.func @transform_0(%arg0: i32) -> (i32, i32) {
    %c0_i32 = arith.constant 0 : i32
    %c0_i32_0 = arith.constant 0 : i32
    return %arg0, %c0_i32 : i32, i32
  }
  func.func @transform_1(%arg0: i32) -> (i32, i32) {
    %c0_i32 = arith.constant 0 : i32
    %c0_i32_0 = arith.constant 0 : i32
    %c0_i32_1 = arith.constant 0 : i32
    return %c0_i32, %c0_i32_0 : i32, i32
  }
  func.func @transform_2(%arg0: i32) -> (i32, i32) {
    %c0_i32 = arith.constant 0 : i32
    %c0_i32_0 = arith.constant 0 : i32
    %c0_i32_1 = arith.constant 0 : i32
    return %c0_i32, %c0_i32_0 : i32, i32
  }
  func.func @transform_3(%arg0: i32) -> (i32, i32) {
    %c0_i32 = arith.constant 0 : i32
    %c0_i32_0 = arith.constant 0 : i32
    return %arg0, %c0_i32 : i32, i32
  }
}

module attributes {stable_mosaic.version = 11 : i64} {
  func.func @_ln_linear_kernel(%arg0: i32, %arg1: memref<2x32xf32, #tpu.memory_space<vmem>>, %arg2: memref<1x32xf32, #tpu.memory_space<vmem>>, %arg3: memref<1x32xf32, #tpu.memory_space<vmem>>, %arg4: memref<32x128xbf16, #tpu.memory_space<vmem>>, %arg5: memref<1x128xf32, #tpu.memory_space<vmem>>, %arg6: memref<2x128xf32, #tpu.memory_space<vmem>>) attributes {dimension_semantics = [#tpu.dimension_semantics<parallel>], iteration_bounds = array<i64: 1>, scalar_prefetch = 0 : i64, scratch_operands = 0 : i64, tpu.core_type = #tpu.core_type<tc>, window_params = [{transform_indices = @transform_0, window_bounds = array<i64: 2, 32>}, {pipeline_mode = #tpu.pipeline_mode<synchronous>, transform_indices = @transform_1, window_bounds = array<i64: 1, 32>}, {pipeline_mode = #tpu.pipeline_mode<synchronous>, transform_indices = @transform_2, window_bounds = array<i64: 1, 32>}, {pipeline_mode = #tpu.pipeline_mode<synchronous>, transform_indices = @transform_3, window_bounds = array<i64: 32, 128>}, {pipeline_mode = #tpu.pipeline_mode<synchronous>, transform_indices = @transform_4, window_bounds = array<i64: 1, 128>}, {transform_indices = @transform_5, window_bounds = array<i64: 2, 128>}]} {
    %c0 = arith.constant 0 : index
    %c0_0 = arith.constant 0 : index
    %0 = vector.load %arg1[%c0, %c0_0] : memref<2x32xf32, #tpu.memory_space<vmem>>, vector<2x32xf32>
    %c0_1 = arith.constant 0 : index
    %c0_2 = arith.constant 0 : index
    %1 = vector.load %arg2[%c0_1, %c0_2] : memref<1x32xf32, #tpu.memory_space<vmem>>, vector<1x32xf32>
    %c0_3 = arith.constant 0 : index
    %c0_4 = arith.constant 0 : index
    %2 = vector.load %arg3[%c0_3, %c0_4] : memref<1x32xf32, #tpu.memory_space<vmem>>, vector<1x32xf32>
    %cst = arith.constant dense<0.000000e+00> : vector<2xf32>
    %3 = vector.multi_reduction <add>, %0, %cst [1] : vector<2x32xf32> to vector<2xf32>
    %4 = vector.shape_cast %3 : vector<2xf32> to vector<2x1xf32>
    %cst_5 = arith.constant 3.200000e+01 : f32
    %5 = vector.broadcast %cst_5 : f32 to vector<2x1xf32>
    %6 = arith.divf %4, %5 : vector<2x1xf32>
    %7 = vector.broadcast %6 : vector<2x1xf32> to vector<2x32xf32>
    %8 = arith.subf %0, %7 : vector<2x32xf32>
    %9 = arith.mulf %8, %8 : vector<2x32xf32>
    %cst_6 = arith.constant dense<0.000000e+00> : vector<2xf32>
    %10 = vector.multi_reduction <add>, %9, %cst_6 [1] : vector<2x32xf32> to vector<2xf32>
    %11 = vector.shape_cast %10 : vector<2xf32> to vector<2x1xf32>
    %cst_7 = arith.constant 3.200000e+01 : f32
    %12 = vector.broadcast %cst_7 : f32 to vector<2x1xf32>
    %13 = arith.divf %11, %12 : vector<2x1xf32>
    %14 = vector.broadcast %6 : vector<2x1xf32> to vector<2x32xf32>
    %15 = arith.subf %0, %14 : vector<2x32xf32>
    %cst_8 = arith.constant 9.99999974E-6 : f32
    %16 = vector.broadcast %cst_8 : f32 to vector<2x1xf32>
    %17 = arith.addf %13, %16 : vector<2x1xf32>
    %18 = math.rsqrt %17 : vector<2x1xf32>
    %19 = vector.broadcast %18 : vector<2x1xf32> to vector<2x32xf32>
    %20 = arith.mulf %15, %19 : vector<2x32xf32>
    %21 = vector.broadcast %1 : vector<1x32xf32> to vector<2x32xf32>
    %22 = arith.mulf %20, %21 : vector<2x32xf32>
    %23 = vector.broadcast %2 : vector<1x32xf32> to vector<2x32xf32>
    %24 = arith.addf %22, %23 : vector<2x32xf32>
    %25 = arith.truncf %24 : vector<2x32xf32> to vector<2x32xbf16>
    %c0_9 = arith.constant 0 : index
    %c0_10 = arith.constant 0 : index
    %26 = vector.load %arg4[%c0_9, %c0_10] : memref<32x128xbf16, #tpu.memory_space<vmem>>, vector<32x128xbf16>
    %cst_11 = arith.constant dense<0.000000e+00> : vector<2x128xf32>
    %27 = tpu.matmul %25, %26, %cst_11 {dimension_numbers = #tpu.dot_dimension_numbers<[1], [0], [0], [1], [0, 0, 1, 1], [], []>} : vector<2x32xbf16>, vector<32x128xbf16>, vector<2x128xf32> -> vector<2x128xf32>
    %c0_12 = arith.constant 0 : index
    %c0_13 = arith.constant 0 : index
    %28 = vector.load %arg5[%c0_12, %c0_13] : memref<1x128xf32, #tpu.memory_space<vmem>>, vector<1x128xf32>
    %29 = vector.broadcast %28 : vector<1x128xf32> to vector<2x128xf32>
    %30 = arith.addf %27, %29 : vector<2x128xf32>
    %c0_14 = arith.constant 0 : index
    %c0_15 = arith.constant 0 : index
    %31 = vector.load %arg6[%c0_14, %c0_15] : memref<2x128xf32, #tpu.memory_space<vmem>>, vector<2x128xf32>
    tpu.vector_store %arg6[%c0_14, %c0_15], %30 {strides = array<i32>} : memref<2x128xf32, #tpu.memory_space<vmem>>, vector<2x128xf32>,
    return
  }
  func.func @transform_0(%arg0: i32) -> (i32, i32) {
    %c0_i32 = arith.constant 0 : i32
    %c0_i32_0 = arith.constant 0 : i32
    return %arg0, %c0_i32 : i32, i32
  }
  func.func @transform_1(%arg0: i32) -> (i32, i32) {
    %c0_i32 = arith.constant 0 : i32
    %c0_i32_0 = arith.constant 0 : i32
    %c0_i32_1 = arith.constant 0 : i32
    return %c0_i32, %c0_i32_0 : i32, i32
  }
  func.func @transform_2(%arg0: i32) -> (i32, i32) {
    %c0_i32 = arith.constant 0 : i32
    %c0_i32_0 = arith.constant 0 : i32
    %c0_i32_1 = arith.constant 0 : i32
    return %c0_i32, %c0_i32_0 : i32, i32
  }
  func.func @transform_3(%arg0: i32) -> (i32, i32) {
    %c0_i32 = arith.constant 0 : i32
    %c0_i32_0 = arith.constant 0 : i32
    %c0_i32_1 = arith.constant 0 : i32
    return %c0_i32, %c0_i32_0 : i32, i32
  }
  func.func @transform_4(%arg0: i32) -> (i32, i32) {
    %c0_i32 = arith.constant 0 : i32
    %c0_i32_0 = arith.constant 0 : i32
    %c0_i32_1 = arith.constant 0 : i32
    return %c0_i32, %c0_i32_0 : i32, i32
  }
  func.func @transform_5(%arg0: i32) -> (i32, i32) {
    %c0_i32 = arith.constant 0 : i32
    %c0_i32_0 = arith.constant 0 : i32
    return %arg0, %c0_i32 : i32, i32
  }
}

module attributes {stable_mosaic.version = 11 : i64} {
  func.func @_layer_kernel(%arg0: i32, %arg1: memref<1x17x32xf32, #tpu.memory_space<vmem>>, %arg2: memref<1x32xf32, #tpu.memory_space<vmem>>, %arg3: memref<1x32xf32, #tpu.memory_space<vmem>>, %arg4: memref<32x96xbf16, #tpu.memory_space<vmem>>, %arg5: memref<32x32xbf16, #tpu.memory_space<vmem>>, %arg6: memref<1x32xf32, #tpu.memory_space<vmem>>, %arg7: memref<1x32xf32, #tpu.memory_space<vmem>>, %arg8: memref<1x32xf32, #tpu.memory_space<vmem>>, %arg9: memref<32x64xbf16, #tpu.memory_space<vmem>>, %arg10: memref<1x64xf32, #tpu.memory_space<vmem>>, %arg11: memref<64x32xbf16, #tpu.memory_space<vmem>>, %arg12: memref<1x32xf32, #tpu.memory_space<vmem>>, %arg13: memref<1x17x32xf32, #tpu.memory_space<vmem>>) attributes {dimension_semantics = [#tpu.dimension_semantics<parallel>], iteration_bounds = array<i64: 2>, scalar_prefetch = 0 : i64, scratch_operands = 0 : i64, tpu.core_type = #tpu.core_type<tc>, window_params = [{transform_indices = @transform_0, window_bounds = array<i64: 1, 17, 32>}, {pipeline_mode = #tpu.pipeline_mode<synchronous>, transform_indices = @transform_1, window_bounds = array<i64: 1, 32>}, {pipeline_mode = #tpu.pipeline_mode<synchronous>, transform_indices = @transform_2, window_bounds = array<i64: 1, 32>}, {pipeline_mode = #tpu.pipeline_mode<synchronous>, transform_indices = @transform_3, window_bounds = array<i64: 32, 96>}, {pipeline_mode = #tpu.pipeline_mode<synchronous>, transform_indices = @transform_4, window_bounds = array<i64: 32, 32>}, {pipeline_mode = #tpu.pipeline_mode<synchronous>, transform_indices = @transform_5, window_bounds = array<i64: 1, 32>}, {pipeline_mode = #tpu.pipeline_mode<synchronous>, transform_indices = @transform_6, window_bounds = array<i64: 1, 32>}, {pipeline_mode = #tpu.pipeline_mode<synchronous>, transform_indices = @transform_7, window_bounds = array<i64: 1, 32>}, {pipeline_mode = #tpu.pipeline_mode<synchronous>, transform_indices = @transform_8, window_bounds = array<i64: 32, 64>}, {pipeline_mode = #tpu.pipeline_mode<synchronous>, transform_indices = @transform_9, window_bounds = array<i64: 1, 64>}, {pipeline_mode = #tpu.pipeline_mode<synchronous>, transform_indices = @transform_10, window_bounds = array<i64: 64, 32>}, {pipeline_mode = #tpu.pipeline_mode<synchronous>, transform_indices = @transform_11, window_bounds = array<i64: 1, 32>}, {transform_indices = @transform_12, window_bounds = array<i64: 1, 17, 32>}]} {
    %c0 = arith.constant 0 : index
    %c0_0 = arith.constant 0 : index
    %c0_1 = arith.constant 0 : index
    %0 = vector.load %arg1[%c0, %c0_0, %c0_1] : memref<1x17x32xf32, #tpu.memory_space<vmem>>, vector<1x17x32xf32>
    %1 = vector.shape_cast %0 : vector<1x17x32xf32> to vector<17x32xf32>
    %c0_2 = arith.constant 0 : index
    %c0_3 = arith.constant 0 : index
    %2 = vector.load %arg2[%c0_2, %c0_3] : memref<1x32xf32, #tpu.memory_space<vmem>>, vector<1x32xf32>
    %c0_4 = arith.constant 0 : index
    %c0_5 = arith.constant 0 : index
    %3 = vector.load %arg3[%c0_4, %c0_5] : memref<1x32xf32, #tpu.memory_space<vmem>>, vector<1x32xf32>
    %cst = arith.constant dense<0.000000e+00> : vector<17xf32>
    %4 = vector.multi_reduction <add>, %1, %cst [1] : vector<17x32xf32> to vector<17xf32>
    %5 = vector.shape_cast %4 : vector<17xf32> to vector<17x1xf32>
    %cst_6 = arith.constant 3.200000e+01 : f32
    %6 = vector.broadcast %cst_6 : f32 to vector<17x1xf32>
    %7 = arith.divf %5, %6 : vector<17x1xf32>
    %8 = vector.broadcast %7 : vector<17x1xf32> to vector<17x32xf32>
    %9 = arith.subf %1, %8 : vector<17x32xf32>
    %10 = arith.mulf %9, %9 : vector<17x32xf32>
    %cst_7 = arith.constant dense<0.000000e+00> : vector<17xf32>
    %11 = vector.multi_reduction <add>, %10, %cst_7 [1] : vector<17x32xf32> to vector<17xf32>
    %12 = vector.shape_cast %11 : vector<17xf32> to vector<17x1xf32>
    %cst_8 = arith.constant 3.200000e+01 : f32
    %13 = vector.broadcast %cst_8 : f32 to vector<17x1xf32>
    %14 = arith.divf %12, %13 : vector<17x1xf32>
    %15 = vector.broadcast %7 : vector<17x1xf32> to vector<17x32xf32>
    %16 = arith.subf %1, %15 : vector<17x32xf32>
    %cst_9 = arith.constant 9.99999974E-6 : f32
    %17 = vector.broadcast %cst_9 : f32 to vector<17x1xf32>
    %18 = arith.addf %14, %17 : vector<17x1xf32>
    %19 = math.rsqrt %18 : vector<17x1xf32>
    %20 = vector.broadcast %19 : vector<17x1xf32> to vector<17x32xf32>
    %21 = arith.mulf %16, %20 : vector<17x32xf32>
    %22 = vector.broadcast %2 : vector<1x32xf32> to vector<17x32xf32>
    %23 = arith.mulf %21, %22 : vector<17x32xf32>
    %24 = vector.broadcast %3 : vector<1x32xf32> to vector<17x32xf32>
    %25 = arith.addf %23, %24 : vector<17x32xf32>
    %26 = arith.truncf %25 : vector<17x32xf32> to vector<17x32xbf16>
    %c0_10 = arith.constant 0 : index
    %c0_11 = arith.constant 0 : index
    %27 = vector.load %arg4[%c0_10, %c0_11] : memref<32x96xbf16, #tpu.memory_space<vmem>>, vector<32x96xbf16>
    %cst_12 = arith.constant dense<0.000000e+00> : vector<17x96xf32>
    %28 = tpu.matmul %26, %27, %cst_12 {dimension_numbers = #tpu.dot_dimension_numbers<[1], [0], [0], [1], [0, 0, 1, 1], [], []>} : vector<17x32xbf16>, vector<32x96xbf16>, vector<17x96xf32> -> vector<17x96xf32>
    %29 = vector.extract_strided_slice %28 {offsets = [0, 0], sizes = [17, 16], strides = [1, 1]} : vector<17x96xf32> to vector<17x16xf32>
    %30 = vector.extract_strided_slice %28 {offsets = [0, 32], sizes = [17, 16], strides = [1, 1]} : vector<17x96xf32> to vector<17x16xf32>
    %31 = vector.extract_strided_slice %28 {offsets = [0, 64], sizes = [17, 16], strides = [1, 1]} : vector<17x96xf32> to vector<17x16xf32>
    %32 = arith.truncf %29 : vector<17x16xf32> to vector<17x16xbf16>
    %33 = arith.truncf %30 : vector<17x16xf32> to vector<17x16xbf16>
    %cst_13 = arith.constant dense<0.000000e+00> : vector<17x17xf32>
    %34 = tpu.matmul %32, %33, %cst_13 {dimension_numbers = #tpu.dot_dimension_numbers<[1], [1], [0], [0], [0, 0, 1, 0], [], []>} : vector<17x16xbf16>, vector<17x16xbf16>, vector<17x17xf32> -> vector<17x17xf32>
    %cst_14 = arith.constant dense<0xFF800000> : vector<17xf32>
    %35 = vector.multi_reduction <maximumf>, %34, %cst_14 [1] : vector<17x17xf32> to vector<17xf32>
    %36 = vector.shape_cast %35 : vector<17xf32> to vector<17x1xf32>
    %37 = vector.broadcast %36 : vector<17x1xf32> to vector<17x17xf32>
    %38 = arith.subf %34, %37 : vector<17x17xf32>
    %39 = math.exp %38 : vector<17x17xf32>
    %cst_15 = arith.constant dense<0.000000e+00> : vector<17xf32>
    %40 = vector.multi_reduction <add>, %39, %cst_15 [1] : vector<17x17xf32> to vector<17xf32>
    %41 = vector.shape_cast %40 : vector<17xf32> to vector<17x1xf32>
    %42 = tpu.reciprocal %41 {approx = true} : vector<17x1xf32> -> vector<17x1xf32>
    %43 = vector.broadcast %42 : vector<17x1xf32> to vector<17x17xf32>
    %44 = arith.mulf %39, %43 : vector<17x17xf32>
    %45 = arith.truncf %44 : vector<17x17xf32> to vector<17x17xbf16>
    %46 = arith.truncf %31 : vector<17x16xf32> to vector<17x16xbf16>
    %cst_16 = arith.constant dense<0.000000e+00> : vector<17x16xf32>
    %47 = tpu.matmul %45, %46, %cst_16 {dimension_numbers = #tpu.dot_dimension_numbers<[1], [0], [0], [1], [0, 0, 1, 1], [], []>} : vector<17x17xbf16>, vector<17x16xbf16>, vector<17x16xf32> -> vector<17x16xf32>
    %48 = vector.extract_strided_slice %28 {offsets = [0, 16], sizes = [17, 16], strides = [1, 1]} : vector<17x96xf32> to vector<17x16xf32>
    %49 = vector.extract_strided_slice %28 {offsets = [0, 48], sizes = [17, 16], strides = [1, 1]} : vector<17x96xf32> to vector<17x16xf32>
    %50 = vector.extract_strided_slice %28 {offsets = [0, 80], sizes = [17, 16], strides = [1, 1]} : vector<17x96xf32> to vector<17x16xf32>
    %51 = arith.truncf %48 : vector<17x16xf32> to vector<17x16xbf16>
    %52 = arith.truncf %49 : vector<17x16xf32> to vector<17x16xbf16>
    %cst_17 = arith.constant dense<0.000000e+00> : vector<17x17xf32>
    %53 = tpu.matmul %51, %52, %cst_17 {dimension_numbers = #tpu.dot_dimension_numbers<[1], [1], [0], [0], [0, 0, 1, 0], [], []>} : vector<17x16xbf16>, vector<17x16xbf16>, vector<17x17xf32> -> vector<17x17xf32>
    %cst_18 = arith.constant dense<0xFF800000> : vector<17xf32>
    %54 = vector.multi_reduction <maximumf>, %53, %cst_18 [1] : vector<17x17xf32> to vector<17xf32>
    %55 = vector.shape_cast %54 : vector<17xf32> to vector<17x1xf32>
    %56 = vector.broadcast %55 : vector<17x1xf32> to vector<17x17xf32>
    %57 = arith.subf %53, %56 : vector<17x17xf32>
    %58 = math.exp %57 : vector<17x17xf32>
    %cst_19 = arith.constant dense<0.000000e+00> : vector<17xf32>
    %59 = vector.multi_reduction <add>, %58, %cst_19 [1] : vector<17x17xf32> to vector<17xf32>
    %60 = vector.shape_cast %59 : vector<17xf32> to vector<17x1xf32>
    %61 = tpu.reciprocal %60 {approx = true} : vector<17x1xf32> -> vector<17x1xf32>
    %62 = vector.broadcast %61 : vector<17x1xf32> to vector<17x17xf32>
    %63 = arith.mulf %58, %62 : vector<17x17xf32>
    %64 = arith.truncf %63 : vector<17x17xf32> to vector<17x17xbf16>
    %65 = arith.truncf %50 : vector<17x16xf32> to vector<17x16xbf16>
    %cst_20 = arith.constant dense<0.000000e+00> : vector<17x16xf32>
    %66 = tpu.matmul %64, %65, %cst_20 {dimension_numbers = #tpu.dot_dimension_numbers<[1], [0], [0], [1], [0, 0, 1, 1], [], []>} : vector<17x17xbf16>, vector<17x16xbf16>, vector<17x16xf32> -> vector<17x16xf32>
    %67 = tpu.concatenate %47, %66 in 1 : vector<17x16xf32>, vector<17x16xf32> -> vector<17x32xf32>
    %68 = arith.truncf %67 : vector<17x32xf32> to vector<17x32xbf16>
    %c0_21 = arith.constant 0 : index
    %c0_22 = arith.constant 0 : index
    %69 = vector.load %arg5[%c0_21, %c0_22] : memref<32x32xbf16, #tpu.memory_space<vmem>>, vector<32x32xbf16>
    %cst_23 = arith.constant dense<0.000000e+00> : vector<17x32xf32>
    %70 = tpu.matmul %68, %69, %cst_23 {dimension_numbers = #tpu.dot_dimension_numbers<[1], [0], [0], [1], [0, 0, 1, 1], [], []>} : vector<17x32xbf16>, vector<32x32xbf16>, vector<17x32xf32> -> vector<17x32xf32>
    %c0_24 = arith.constant 0 : index
    %c0_25 = arith.constant 0 : index
    %71 = vector.load %arg6[%c0_24, %c0_25] : memref<1x32xf32, #tpu.memory_space<vmem>>, vector<1x32xf32>
    %72 = vector.broadcast %71 : vector<1x32xf32> to vector<17x32xf32>
    %73 = arith.addf %70, %72 : vector<17x32xf32>
    %74 = arith.addf %1, %73 : vector<17x32xf32>
    %c0_26 = arith.constant 0 : index
    %c0_27 = arith.constant 0 : index
    %75 = vector.load %arg7[%c0_26, %c0_27] : memref<1x32xf32, #tpu.memory_space<vmem>>, vector<1x32xf32>
    %c0_28 = arith.constant 0 : index
    %c0_29 = arith.constant 0 : index
    %76 = vector.load %arg8[%c0_28, %c0_29] : memref<1x32xf32, #tpu.memory_space<vmem>>, vector<1x32xf32>
    %cst_30 = arith.constant dense<0.000000e+00> : vector<17xf32>
    %77 = vector.multi_reduction <add>, %74, %cst_30 [1] : vector<17x32xf32> to vector<17xf32>
    %78 = vector.shape_cast %77 : vector<17xf32> to vector<17x1xf32>
    %cst_31 = arith.constant 3.200000e+01 : f32
    %79 = vector.broadcast %cst_31 : f32 to vector<17x1xf32>
    %80 = arith.divf %78, %79 : vector<17x1xf32>
    %81 = vector.broadcast %80 : vector<17x1xf32> to vector<17x32xf32>
    %82 = arith.subf %74, %81 : vector<17x32xf32>
    %83 = arith.mulf %82, %82 : vector<17x32xf32>
    %cst_32 = arith.constant dense<0.000000e+00> : vector<17xf32>
    %84 = vector.multi_reduction <add>, %83, %cst_32 [1] : vector<17x32xf32> to vector<17xf32>
    %85 = vector.shape_cast %84 : vector<17xf32> to vector<17x1xf32>
    %cst_33 = arith.constant 3.200000e+01 : f32
    %86 = vector.broadcast %cst_33 : f32 to vector<17x1xf32>
    %87 = arith.divf %85, %86 : vector<17x1xf32>
    %88 = vector.broadcast %80 : vector<17x1xf32> to vector<17x32xf32>
    %89 = arith.subf %74, %88 : vector<17x32xf32>
    %cst_34 = arith.constant 9.99999974E-6 : f32
    %90 = vector.broadcast %cst_34 : f32 to vector<17x1xf32>
    %91 = arith.addf %87, %90 : vector<17x1xf32>
    %92 = math.rsqrt %91 : vector<17x1xf32>
    %93 = vector.broadcast %92 : vector<17x1xf32> to vector<17x32xf32>
    %94 = arith.mulf %89, %93 : vector<17x32xf32>
    %95 = vector.broadcast %75 : vector<1x32xf32> to vector<17x32xf32>
    %96 = arith.mulf %94, %95 : vector<17x32xf32>
    %97 = vector.broadcast %76 : vector<1x32xf32> to vector<17x32xf32>
    %98 = arith.addf %96, %97 : vector<17x32xf32>
    %99 = arith.truncf %98 : vector<17x32xf32> to vector<17x32xbf16>
    %c0_35 = arith.constant 0 : index
    %c0_36 = arith.constant 0 : index
    %100 = vector.load %arg9[%c0_35, %c0_36] : memref<32x64xbf16, #tpu.memory_space<vmem>>, vector<32x64xbf16>
    %cst_37 = arith.constant dense<0.000000e+00> : vector<17x64xf32>
    %101 = tpu.matmul %99, %100, %cst_37 {dimension_numbers = #tpu.dot_dimension_numbers<[1], [0], [0], [1], [0, 0, 1, 1], [], []>} : vector<17x32xbf16>, vector<32x64xbf16>, vector<17x64xf32> -> vector<17x64xf32>
    %c0_38 = arith.constant 0 : index
    %c0_39 = arith.constant 0 : index
    %102 = vector.load %arg10[%c0_38, %c0_39] : memref<1x64xf32, #tpu.memory_space<vmem>>, vector<1x64xf32>
    %103 = vector.broadcast %102 : vector<1x64xf32> to vector<17x64xf32>
    %104 = arith.addf %101, %103 : vector<17x64xf32>
    %cst_40 = arith.constant 5.000000e-01 : f32
    %105 = vector.broadcast %cst_40 : f32 to vector<17x64xf32>
    %106 = arith.mulf %105, %104 : vector<17x64xf32>
    %cst_41 = arith.constant 0.707106769 : f32
    %107 = vector.broadcast %cst_41 : f32 to vector<17x64xf32>
    %108 = arith.mulf %104, %107 : vector<17x64xf32>
    %cst_42 = arith.constant 0.000000e+00 : f32
    %109 = vector.broadcast %cst_42 : f32 to vector<17x64xf32>
    %110 = arith.cmpf oge, %108, %109 : vector<17x64xf32>
    %cst_43 = arith.constant 1.000000e+00 : f32
    %cst_44 = arith.constant -1.000000e+00 : f32
    %111 = vector.broadcast %cst_43 : f32 to vector<17x64xf32>
    %112 = vector.broadcast %cst_44 : f32 to vector<17x64xf32>
    %113 = arith.select %110, %111, %112 : vector<17x64xi1>, vector<17x64xf32>
    %114 = math.absf %108 : vector<17x64xf32>
    %cst_45 = arith.constant 0.327591091 : f32
    %115 = vector.broadcast %cst_45 : f32 to vector<17x64xf32>
    %116 = arith.mulf %115, %114 : vector<17x64xf32>
    %cst_46 = arith.constant 1.000000e+00 : f32
    %117 = vector.broadcast %cst_46 : f32 to vector<17x64xf32>
    %118 = arith.addf %117, %116 : vector<17x64xf32>
    %cst_47 = arith.constant 1.000000e+00 : f32
    %119 = vector.broadcast %cst_47 : f32 to vector<17x64xf32>
    %120 = arith.divf %119, %118 : vector<17x64xf32>
    %cst_48 = arith.constant 1.06140542 : f32
    %121 = vector.broadcast %cst_48 : f32 to vector<17x64xf32>
    %122 = arith.mulf %120, %121 : vector<17x64xf32>
    %cst_49 = arith.constant -1.45315206 : f32
    %123 = vector.broadcast %cst_49 : f32 to vector<17x64xf32>
    %124 = arith.addf %123, %122 : vector<17x64xf32>
    %125 = arith.mulf %120, %124 : vector<17x64xf32>
    %cst_50 = arith.constant 1.42141378 : f32
    %126 = vector.broadcast %cst_50 : f32 to vector<17x64xf32>
    %127 = arith.addf %126, %125 : vector<17x64xf32>
    %128 = arith.mulf %120, %127 : vector<17x64xf32>
    %cst_51 = arith.constant -0.284496725 : f32
    %129 = vector.broadcast %cst_51 : f32 to vector<17x64xf32>
    %130 = arith.addf %129, %128 : vector<17x64xf32>
    %131 = arith.mulf %120, %130 : vector<17x64xf32>
    %cst_52 = arith.constant 0.254829586 : f32
    %132 = vector.broadcast %cst_52 : f32 to vector<17x64xf32>
    %133 = arith.addf %132, %131 : vector<17x64xf32>
    %134 = arith.mulf %120, %133 : vector<17x64xf32>
    %cst_53 = arith.constant 0.000000e+00 : f32
    %135 = vector.broadcast %cst_53 : f32 to vector<17x64xf32>
    %136 = arith.subf %135, %114 : vector<17x64xf32>
    %137 = arith.mulf %136, %114 : vector<17x64xf32>
    %138 = math.exp %137 : vector<17x64xf32>
    %139 = arith.mulf %134, %138 : vector<17x64xf32>
    %cst_54 = arith.constant 1.000000e+00 : f32
    %140 = vector.broadcast %cst_54 : f32 to vector<17x64xf32>
    %141 = arith.subf %140, %139 : vector<17x64xf32>
    %142 = arith.mulf %113, %141 : vector<17x64xf32>
    %cst_55 = arith.constant 1.000000e+00 : f32
    %143 = vector.broadcast %cst_55 : f32 to vector<17x64xf32>
    %144 = arith.addf %143, %142 : vector<17x64xf32>
    %145 = arith.mulf %106, %144 : vector<17x64xf32>
    %146 = arith.truncf %145 : vector<17x64xf32> to vector<17x64xbf16>
    %c0_56 = arith.constant 0 : index
    %c0_57 = arith.constant 0 : index
    %147 = vector.load %arg11[%c0_56, %c0_57] : memref<64x32xbf16, #tpu.memory_space<vmem>>, vector<64x32xbf16>
    %cst_58 = arith.constant dense<0.000000e+00> : vector<17x32xf32>
    %148 = tpu.matmul %146, %147, %cst_58 {dimension_numbers = #tpu.dot_dimension_numbers<[1], [0], [0], [1], [0, 0, 1, 1], [], []>} : vector<17x64xbf16>, vector<64x32xbf16>, vector<17x32xf32> -> vector<17x32xf32>
    %c0_59 = arith.constant 0 : index
    %c0_60 = arith.constant 0 : index
    %149 = vector.load %arg12[%c0_59, %c0_60] : memref<1x32xf32, #tpu.memory_space<vmem>>, vector<1x32xf32>
    %150 = vector.broadcast %149 : vector<1x32xf32> to vector<17x32xf32>
    %151 = arith.addf %148, %150 : vector<17x32xf32>
    %152 = arith.addf %74, %151 : vector<17x32xf32>
    %c0_61 = arith.constant 0 : index
    %c0_62 = arith.constant 0 : index
    %c0_63 = arith.constant 0 : index
    %153 = vector.load %arg13[%c0_61, %c0_62, %c0_63] : memref<1x17x32xf32, #tpu.memory_space<vmem>>, vector<1x17x32xf32>
    %154 = vector.shape_cast %153 : vector<1x17x32xf32> to vector<17x32xf32>
    %155 = vector.shape_cast %152 : vector<17x32xf32> to vector<1x17x32xf32>
    tpu.vector_store %arg13[%c0_61, %c0_62, %c0_63], %155 {strides = array<i32>} : memref<1x17x32xf32, #tpu.memory_space<vmem>>, vector<1x17x32xf32>,
    return
  }
  func.func @transform_0(%arg0: i32) -> (i32, i32, i32) {
    %c0_i32 = arith.constant 0 : i32
    %c0_i32_0 = arith.constant 0 : i32
    %c0_i32_1 = arith.constant 0 : i32
    return %arg0, %c0_i32, %c0_i32_0 : i32, i32, i32
  }
  func.func @transform_1(%arg0: i32) -> (i32, i32) {
    %c0_i32 = arith.constant 0 : i32
    %c0_i32_0 = arith.constant 0 : i32
    %c0_i32_1 = arith.constant 0 : i32
    return %c0_i32, %c0_i32_0 : i32, i32
  }
  func.func @transform_2(%arg0: i32) -> (i32, i32) {
    %c0_i32 = arith.constant 0 : i32
    %c0_i32_0 = arith.constant 0 : i32
    %c0_i32_1 = arith.constant 0 : i32
    return %c0_i32, %c0_i32_0 : i32, i32
  }
  func.func @transform_3(%arg0: i32) -> (i32, i32) {
    %c0_i32 = arith.constant 0 : i32
    %c0_i32_0 = arith.constant 0 : i32
    %c0_i32_1 = arith.constant 0 : i32
    return %c0_i32, %c0_i32_0 : i32, i32
  }
  func.func @transform_4(%arg0: i32) -> (i32, i32) {
    %c0_i32 = arith.constant 0 : i32
    %c0_i32_0 = arith.constant 0 : i32
    %c0_i32_1 = arith.constant 0 : i32
    return %c0_i32, %c0_i32_0 : i32, i32
  }
  func.func @transform_5(%arg0: i32) -> (i32, i32) {
    %c0_i32 = arith.constant 0 : i32
    %c0_i32_0 = arith.constant 0 : i32
    %c0_i32_1 = arith.constant 0 : i32
    return %c0_i32, %c0_i32_0 : i32, i32
  }
  func.func @transform_6(%arg0: i32) -> (i32, i32) {
    %c0_i32 = arith.constant 0 : i32
    %c0_i32_0 = arith.constant 0 : i32
    %c0_i32_1 = arith.constant 0 : i32
    return %c0_i32, %c0_i32_0 : i32, i32
  }
  func.func @transform_7(%arg0: i32) -> (i32, i32) {
    %c0_i32 = arith.constant 0 : i32
    %c0_i32_0 = arith.constant 0 : i32
    %c0_i32_1 = arith.constant 0 : i32
    return %c0_i32, %c0_i32_0 : i32, i32
  }
  func.func @transform_8(%arg0: i32) -> (i32, i32) {
    %c0_i32 = arith.constant 0 : i32
    %c0_i32_0 = arith.constant 0 : i32
    %c0_i32_1 = arith.constant 0 : i32
    return %c0_i32, %c0_i32_0 : i32, i32
  }
  func.func @transform_9(%arg0: i32) -> (i32, i32) {
    %c0_i32 = arith.constant 0 : i32
    %c0_i32_0 = arith.constant 0 : i32
    %c0_i32_1 = arith.constant 0 : i32
    return %c0_i32, %c0_i32_0 : i32, i32
  }
  func.func @transform_10(%arg0: i32) -> (i32, i32) {
    %c0_i32 = arith.constant 0 : i32
    %c0_i32_0 = arith.constant 0 : i32
    %c0_i32_1 = arith.constant 0 : i32
    return %c0_i32, %c0_i32_0 : i32, i32
  }
  func.func @transform_11(%arg0: i32) -> (i32, i32) {
    %c0_i32 = arith.constant 0 : i32
    %c0_i32_0 = arith.constant 0 : i32
    %c0_i32_1 = arith.constant 0 : i32
    return %c0_i32, %c0_i32_0 : i32, i32
  }
  func.func @transform_12(%arg0: i32) -> (i32, i32, i32) {
    %c0_i32 = arith.constant 0 : i32
    %c0_i32_0 = arith.constant 0 : i32
    %c0_i32_1 = arith.constant 0 : i32
    return %arg0, %c0_i32, %c0_i32_0 : i32, i32, i32
  }
}

</mosaic_0001>

<bundles_post_ra>
// kernel: tpu_custom_call.1
= control target key start
LH: loop header
LB: loop body
LE: loop exit
PB: predicated region body
PF: predicated region fallthrough
CT: control target
= control target key end

     0   :  { %7 = vsyncpa [#allocation3], 0  ;;  %s351_s0 = inlined_call_operand.hbm [shape: f32[8,128], index: 0, kind: input, shape index: {}]   ;;  %s352_s1 = inlined_call_operand.hbm [shape: bf16[128,128], index: 1, kind: input, shape index: {}]   ;;  %s353_s2 = inlined_call_operand.hbm [shape: f32[8,128], index: 2, kind: output, shape index: {}]  }
   0x1   :  { %8 = vsyncpa [#allocation6], 0 }
   0x2   :  { %9 = vsyncpa [#allocation4], 0  ;;  %s286_s9 = smov [#allocation2]   ;;  %s287_s11 = smov [#allocation5]  }
   0x3   :  { %s16_s10 = sshll.u32 %s286_s9, 4  ;;  %s25_s12 = sshll.u32 %s287_s11, 4  ;;  %s17_s10 = int_to_ptr.vmem [resolvable:$true] %s16_s10  ;;  %s308_s12 = int_to_ptr.vmem [resolvable:$true] %s25_s12 }
   0x4   :  { %s214_s15 = scalar_lea.hbm %s351_s0, 128 }
   0x5   :  { %p215_p0 = scmp.ne.s32.totalorder %s351_s0, %s214_s15  ;;  %p218_p1 = scmp.lt.u32.totalorder %s214_s15, %s351_s0 }
   0x7   :  { %p220_p2 = pnand %p218_p1, %p215_p0 }
   0x9   :  { %223 = shalt.err (!%p220_p2)
}
   0xa   :  { %s224_s20 = scalar_lea.vmem %s17_s10, 128  ;;  %p229_p4 = scmp.lt.s32.totalorder %s17_s10, %s17_s10 }
   0xb   :  { %p225_p3 = scmp.ne.s32.totalorder %s17_s10, %s224_s20  ;;  %p230_p5 = scmp.lt.s32.totalorder %s224_s20, %s224_s20 }
   0xd   :  { %p231_p6 = por %p230_p5, %p229_p4 }
   0xf   :  { %p232_p7 = pnand %p231_p6, %p225_p3 }
  0x11   :  { %235 = shalt.err (!%p232_p7)
}
  0x12   :  { %19 = dma.hbm_to_vmem [thread:$0]  %s351_s0, 128, %s17_s10, [#allocation3]  }
  0x13   :  { %s236_s25 = scalar_lea.hbm %s352_s1, 1024 }
  0x14   :  { %p237_p8 = scmp.ne.s32.totalorder %s352_s1, %s236_s25  ;;  %p240_p9 = scmp.lt.u32.totalorder %s236_s25, %s352_s1 }
  0x16   :  { %p242_p10 = pnand %p240_p9, %p237_p8 }
  0x18   :  { %245 = shalt.err (!%p242_p10)
}
  0x19   :  { %s246_s30 = scalar_lea.vmem %s308_s12, 1024  ;;  %p251_p12 = scmp.lt.s32.totalorder %s308_s12, %s308_s12 }
  0x1a   :  { %p247_p11 = scmp.ne.s32.totalorder %s308_s12, %s246_s30  ;;  %p252_p13 = scmp.lt.s32.totalorder %s246_s30, %s246_s30 }
  0x1c   :  { %p253_p0 = por %p252_p13, %p251_p12 }
  0x1e   :  { %p254_p1 = pnand %p253_p0, %p247_p11 }
  0x20   :  { %257 = shalt.err (!%p254_p1)
}
  0x21   :  { %s288_s0 = smov 64   ;;  %s289_s3 = smov 4  }
  0x22   :  { %31 = dma.hbm_to_vmem [thread:$0]  %s352_s1, 1024, %s308_s12, [#allocation6], %s288_s0, %s288_s0, %s289_s3  }
  0x23   :  { %280 = dma.done.wait [#allocation3], 128  }
  0x24   :  { %281 = vsyncadd [#allocation3], 4294967168 }
  0x25   :  { %282 = dma.done.wait [#allocation6], 1024  }
  0x26   :  { %283 = vsyncadd [#allocation6], 4294966272  ;;  %v290_v0 = vmov 0.0   ;;  %vm291_vm0 = vmmov 0   ;;  %v206_v1 = vld [vmem:[#allocation5] sm:$0xff]   ;;  %v207_v2 = vld [vmem:[#allocation5 + $0x8] sm:$0xff]  }
  0x27   :  { %179 = vmatprep.subr.bf16.mxu0 %v290_v0  ;;  %195 = vmatprep.mubr.msk.bf16.mxu0 %vm291_vm0, %v290_v0  ;;  %v208_v3 = vld [vmem:[#allocation5 + $0x10] sm:$0xff]   ;;  %v209_v4 = vld [vmem:[#allocation5 + $0x18] sm:$0xff]   ;;  %v210_v5 = vld [vmem:[#allocation5 + $0x20] sm:$0xff]   ;;  %s292_s1 = smov [#allocation7]  }
  0x28   :  { %180 = vmatpush3.bf16.msra.mxu0 %v206_v1  ;;  %v211_v6 = vld [vmem:[#allocation5 + $0x28] sm:$0xff]   ;;  %v212_v7 = vld [vmem:[#allocation5 + $0x30] sm:$0xff]   ;;  %v213_v8 = vld [vmem:[#allocation5 + $0x38] sm:$0xff]   ;;  %s152_s6 = sshll.u32 %s292_s1, 4  ;;  %s153_s6 = int_to_ptr.vmem [resolvable:$true] %s152_s6 }
  0x29   :  { %181 = vmatprep.subr.bf16.mxu0 %v290_v0  ;;  %v39_v9 = vld [vmem:[#allocation2] sm:$0xff]  ;;  %s258_s7 = scalar_lea.vmem %s153_s6, 128  ;;  %p263_p3 = scmp.lt.s32.totalorder %s153_s6, %s153_s6 }
  0x2a   :  { %v40_v10 = vpack.c.bf16 %v39_v9, %v39_v9  ;;  %p259_p2 = scmp.ne.s32.totalorder %s153_s6, %s258_s7  ;;  %p264_p4 = scmp.lt.s32.totalorder %s258_s7, %s258_s7 }
  0x2c   :  { %182 = vmatpush3.bf16.msra.mxu0 %v207_v2  ;;  %p265_p5 = por %p264_p4, %p263_p3 }
  0x2d   :  { %183 = vmatprep.subr.bf16.mxu0 %v290_v0 }
  0x2e   :  { %p266_p6 = pnand %p265_p5, %p259_p2 }
  0x30   :  { %184 = vmatpush3.bf16.msra.mxu0 %v208_v3 }
  0x31   :  { %185 = vmatprep.subr.bf16.mxu0 %v290_v0 }
  0x34   :  { %186 = vmatpush3.bf16.msra.mxu0 %v209_v4 }
  0x35   :  { %187 = vmatprep.subr.bf16.mxu0 %v290_v0 }
  0x38   :  { %188 = vmatpush3.bf16.msra.mxu0 %v210_v5 }
  0x39   :  { %189 = vmatprep.subr.bf16.mxu0 %v290_v0 }
  0x3c   :  { %190 = vmatpush3.bf16.msra.mxu0 %v211_v6 }
  0x3d   :  { %191 = vmatprep.subr.bf16.mxu0 %v290_v0 }
  0x40   :  { %192 = vmatpush3.bf16.msra.mxu0 %v212_v7 }
  0x41   :  { %193 = vmatprep.subr.bf16.mxu0 %v290_v0 }
  0x44   :  { %194 = vmatpush3.bf16.msra.mxu0 %v213_v8 }
  0x47   :  { %196 = vmatmul.mubr.bf16.vlgmr.msra.gmra.mrb[0].mxu0 %v40_v10 }
 0x11a   :  { %v139_v11 = vpop.f32.mrb[0].mxu0 }
 0x11b   :  { %145 = vst [vmem:[#allocation7] sm:$0xff] %v139_v11  ;;  %v197_v12 = vpop.f32.mrb[1].mxu0 }
 0x11c   :  { %v142_v13 = vpop.f32.mrb[2].mxu0 }
 0x11d   :  { %269 = shalt.err (!%p266_p6)
}
 0x11e   :  { %s270_s10 = scalar_lea.hbm %s353_s2, 128 }
 0x11f   :  { %p271_p7 = scmp.ne.s32.totalorder %s353_s2, %s270_s10  ;;  %p274_p8 = scmp.lt.u32.totalorder %s270_s10, %s353_s2 }
 0x121   :  { %p276_p9 = pnand %p274_p8, %p271_p7 }
 0x123   :  { %279 = shalt.err (!%p276_p9)
}
 0x124   :  { %155 = dma.vmem_to_hbm [thread:$0]  %s153_s6, 128, %s353_s2, [#allocation4]   ;;  %v198_v14 = vpop.f32.mrb[3].mxu0 }
 0x125   :  { %284 = dma.done.wait [#allocation4], 128  }
 0x126   :  { %285 = vsyncadd [#allocation4], 4294967168 }
 0x127   :  { %159 = vsyncpa [#allocation3], 1 }
 0x128   :  { %160 = vsyncpa [#allocation6], 1 }
 0x129   :  { %161 = vsyncpa [#allocation4], 1 }

// kernel: vit_forward.4
= control target key start
LH: loop header
LB: loop body
LE: loop exit
PB: predicated region body
PF: predicated region fallthrough
CT: control target
= control target key end

     0   :  { %vm52_vm0 = vcmask 392192   ;;  %vm108_vm1 = vcmask 261120   ;;  %s197_s1 = inlined_call_operand.vmem [shape: bf16[48,32], index: 1, kind: input, shape index: {}]   ;;  %s198_s0 = inlined_call_operand.vmem [shape: f32[32,48], index: 0, kind: input, shape index: {}]   ;;  %s199_s2 = inlined_call_operand.vmem [shape: f32[1,32], index: 2, kind: input, shape index: {}]   ;;  %s200_s3 = inlined_call_operand.vmem [shape: f32[32,32], index: 3, kind: output, shape index: {}]  }
   0x1   :  { %v138_v0 = vld [vmem:[%s197_s1] sm:$0xff]   ;;  %v139_v1 = vld [vmem:[%s197_s1 + $0x8] sm:$0xff]   ;;  %v140_v4 = vld [vmem:[%s197_s1 + $0x10] sm:$0xff]  }
   0x2   :  { %128 = vmatprep.subr.bf16.mxu0 %v138_v0  ;;  %v15_v2 = vld [vmem:[%s198_s0] sm:$0xff]  ;;  %v16_v3 = vld [vmem:[%s198_s0 + $0x8] sm:$0xff]  ;;  %v17_v6 = vld [vmem:[%s198_s0 + $0x10] sm:$0xff] }
   0x3   :  { %129 = vmatpush3.bf16.msra.mxu0 %v138_v0  ;;  %v19_v5 = vpack.c.bf16 %v16_v3, %v15_v2  ;;  %v18_v7 = vld [vmem:[%s198_s0 + $0x18] sm:$0xff]  ;;  %v117_v9 = vld [vmem:[%s199_s2] ss:$0 sm:$0xff] }
   0x4   :  { %130 = vmatprep.subr.bf16.mxu0 %v139_v1  ;;  %v20_v8 = vpack.c.bf16 %v18_v7, %v17_v6 }
   0x5   :  { %134 = vmatprep.mubr.msk.bf16.mxu0 %vm52_vm0, %v19_v5 }
   0x7   :  { %131 = vmatpush3.bf16.msra.mxu0 %v139_v1 }
   0x8   :  { %132 = vmatprep.subr.bf16.mxu0 %v140_v4 }
   0xb   :  { %133 = vmatpush3.bf16.msra.mxu0 %v140_v4 }
   0xe   :  { %135 = vmatmul.mubr.msk.bf16.vlgmr.msra.gmra.mrb[0].mxu0 %vm52_vm0, %v20_v8 }
  0xe1   :  { %v136_v10 = vpop.f32.mrb[0].mxu0 }
  0xe2   :  { %v102_v11 = vadd.f32 %v136_v10, %v117_v9  ;;  %v93_v12 = vpop.f32.mrb[1].mxu0 }
  0xe3   :  { %v94_v13 = vadd.f32 %v117_v9, %v93_v12  ;;  %v137_v14 = vpop.f32.mrb[2].mxu0 }
  0xe4   :  { %111 = vst.msk [vmem:[%s200_s3 + $0x10] sm:$0xff] %vm108_vm1, %v102_v11  ;;  %v105_v15 = vadd.f32 %v137_v14, %v117_v9  ;;  %v96_v16 = vpop.f32.mrb[3].mxu0 }
  0xe5   :  { %109 = vst.msk [vmem:[%s200_s3] sm:$0xff] %vm108_vm1, %v94_v13  ;;  %v97_v17 = vadd.f32 %v117_v9, %v96_v16 }
  0xe6   :  { %112 = vst.msk [vmem:[%s200_s3 + $0x18] sm:$0xff] %vm108_vm1, %v105_v15 }
  0xe7   :  { %110 = vst.msk [vmem:[%s200_s3 + $0x8] sm:$0xff] %vm108_vm1, %v97_v17 }

// kernel: vit_forward.7
= control target key start
LH: loop header
LB: loop body
LE: loop exit
PB: predicated region body
PF: predicated region fallthrough
CT: control target
= control target key end

     0   :  { %vm25_vm0 = vcmask 254976   ;;  %s248_s0 = inlined_call_operand.vmem [shape: f32[2,32], index: 0, kind: input, shape index: {}]   ;;  %s249_s1 = inlined_call_operand.vmem [shape: f32[1,32], index: 1, kind: input, shape index: {}]   ;;  %s250_s2 = inlined_call_operand.vmem [shape: f32[1,32], index: 2, kind: input, shape index: {}]   ;;  %s251_s3 = inlined_call_operand.vmem [shape: bf16[32,128], index: 3, kind: input, shape index: {}]   ;;  %s252_s4 = inlined_call_operand.vmem [shape: f32[1,128], index: 4, kind: input, shape index: {}]   ;;  %s253_s5 = inlined_call_operand.hbm [shape: f32[2,128], index: 5, kind: output, shape index: {}]  }
   0x1   :  { %v22_v0 = vld [vmem:[%s248_s0] sm:$0x3] }
   0x2   :  { %v26_v1 = vsel %vm25_vm0, %v22_v0, 0.0 }
   0x3   :  { %27 = vadd.xlane.f32.xlu0 %v26_v1 }
   0x4   :  { %10 = vsyncpa [#allocation3], 0  ;;  %v157_v7 = vld [vmem:[%s251_s3] sm:$0xff]   ;;  %v185_v8 = vmov 0.0   ;;  %v158_v9 = vld [vmem:[%s251_s3 + $0x8] sm:$0xff]   ;;  %vm186_vm1 = vmmov 0  }
   0x5   :  { %146 = vmatprep.subr.bf16.mxu0 %v185_v8  ;;  %150 = vmatprep.mubr.msk.bf16.mxu0 %vm186_vm1, %v185_v8  ;;  %v137_v14 = vld [vmem:[%s249_s1] ss:$0 sm:$0xff]  ;;  %vm78_vm2 = vcmask 261120   ;;  %s187_s28 = smov [#allocation2]  }
   0x6   :  { %147 = vmatpush3.bf16.msra.mxu0 %v157_v7  ;;  %v138_v16 = vld [vmem:[%s250_s2] ss:$0 sm:$0xff]  ;;  %s129_s29 = sshll.u32 %s187_s28, 4  ;;  %s130_s29 = int_to_ptr.vmem [resolvable:$true] %s129_s29 }
   0x7   :  { %148 = vmatprep.subr.bf16.mxu0 %v185_v8  ;;  %v139_v20 = vld [vmem:[%s252_s4] ss:$0 sm:$0xff]  ;;  %s161_s1 = scalar_lea.vmem %s130_s29, 32  ;;  %p166_p1 = scmp.lt.s32.totalorder %s130_s29, %s130_s29 }
   0x8   :  { %p162_p0 = scmp.ne.s32.totalorder %s130_s29, %s161_s1  ;;  %p167_p2 = scmp.lt.s32.totalorder %s161_s1, %s161_s1 }
   0xa   :  { %149 = vmatpush3.bf16.msra.mxu0 %v158_v9  ;;  %p168_p3 = por %p167_p2, %p166_p1 }
   0xc   :  { %p169_p4 = pnand %p168_p3, %p162_p0 }
  0x90   :  { %v28_v2 = vpop.xlane.xlu0 %27 }
  0x91   :  { %v30_v3 = vmul.f32 0.03125, %v28_v2 }
  0x93   :  { %v31_v4 = vsub.f32 %v22_v0, %v30_v3 }
  0x95   :  { %v32_v5 = vmul.f32 %v31_v4, %v31_v4 }
  0x97   :  { %v33_v6 = vsel %vm25_vm0, %v32_v5, 0.0 }
  0x98   :  { %34 = vadd.xlane.f32.xlu0 %v33_v6 }
 0x125   :  { %v35_v10 = vpop.xlane.xlu0 %34 }
 0x126   :  { %v36_v11 = vmul.f32 0.03125, %v35_v10 }
 0x128   :  { %v37_v12 = vadd.f32 1e-05, %v36_v11 }
 0x12a   :  { %159 = vrsqrt.f32 %v37_v12 }
 0x134   :  { %v160_v13 = vpop.eup %159 }
 0x135   :  { %v39_v15 = vmul.f32 %v160_v13, %v31_v4 }
 0x137   :  { %v46_v17 = vmul.f32 %v137_v14, %v39_v15 }
 0x139   :  { %v53_v18 = vadd.f32 %v138_v16, %v46_v17 }
 0x13b   :  { %v54_v19 = vpack.c.bf16 %v53_v18, %v53_v18 }
 0x13d   :  { %151 = vmatmul.mubr.msk.bf16.vlgmr.msra.gmra.mrb[0].mxu0 %vm78_vm2, %v54_v19 }
 0x210   :  { %v116_v21 = vpop.f32.mrb[0].mxu0 }
 0x211   :  { %v117_v22 = vadd.f32 %v139_v20, %v116_v21  ;;  %v152_v23 = vpop.f32.mrb[1].mxu0 }
 0x212   :  { %v119_v24 = vpop.f32.mrb[2].mxu0 }
 0x213   :  { %122 = vst [vmem:[#allocation2] sm:$0x3] %v117_v22  ;;  %v153_v25 = vpop.f32.mrb[3].mxu0 }
 0x214   :  { %172 = shalt.err (!%p169_p4)
}
 0x215   :  { %s173_s4 = scalar_lea.hbm %s253_s5, 32 }
 0x216   :  { %p174_p5 = scmp.ne.s32.totalorder %s253_s5, %s173_s4  ;;  %p177_p6 = scmp.lt.u32.totalorder %s173_s4, %s253_s5 }
 0x218   :  { %p179_p7 = pnand %p177_p6, %p174_p5 }
 0x21a   :  { %182 = shalt.err (!%p179_p7)
}
 0x21b   :  { %132 = dma.vmem_to_hbm [thread:$0]  %s130_s29, 32, %s253_s5, [#allocation3]  }
 0x21c   :  { %183 = dma.done.wait [#allocation3], 32  }
 0x21d   :  { %184 = vsyncadd [#allocation3], 4294967264 }
 0x21e   :  { %136 = vsyncpa [#allocation3], 1 }

// kernel: vit_forward.5
= control target key start
LH: loop header
LB: loop body
LE: loop exit
PB: predicated region body
PF: predicated region fallthrough
CT: control target
= control target key end

     0   :  { %s1670_s21 = smov 0   ;;  %s1880_s0 = inlined_call_operand.vmem [shape: f32[2,17,32], index: 0, kind: input, shape index: {}]   ;;  %s1881_s1 = inlined_call_operand.vmem [shape: f32[1,32], index: 1, kind: input, shape index: {}]   ;;  %s1882_s2 = inlined_call_operand.vmem [shape: f32[1,32], index: 2, kind: input, shape index: {}]   ;;  %s1883_s3 = inlined_call_operand.vmem [shape: bf16[32,96], index: 3, kind: input, shape index: {}]   ;;  %s1884_s4 = inlined_call_operand.vmem [shape: bf16[32,32], index: 4, kind: input, shape index: {}]   ;;  %s1885_s5 = inlined_call_operand.vmem [shape: f32[1,32], index: 5, kind: input, shape index: {}]   ;;  %s1886_s6 = inlined_call_operand.vmem [shape: f32[1,32], index: 6, kind: input, shape index: {}]   ;;  %s1887_s7 = inlined_call_operand.vmem [shape: f32[1,32], index: 7, kind: input, shape index: {}]   ;;  %s1888_s8 = inlined_call_operand.vmem [shape: bf16[32,64], index: 8, kind: input, shape index: {}]   ;;  %s1889_s9 = inlined_call_operand.vmem [shape: f32[1,64], index: 9, kind: input, shape index: {}]   ;;  %s1890_s10 = inlined_call_operand.vmem [shape: bf16[64,32], index: 10, kind: input, shape index: {}]   ;;  %s1891_s11 = inlined_call_operand.vmem [shape: f32[1,32], index: 11, kind: input, shape index: {}]   ;;  %s1892_s12 = inlined_call_operand.vmem [shape: f32[2,17,32], index: 12, kind: output, shape index: {}]  }
   0x1 LB: > { %s1361_s22 = sadd.s32 4294967295, %s1595_s21   ;;  %p1365_p0 = scmp.ge.s32.totalorder %s1595_s21, 1  ;;  %s1595_s21 = sphi %s1670_s21, %s22_s21  }
   0x2   : > { %p362_p1 = scmp.lt.s32.totalorder %s1595_s21, 3 }
   0x4   : > { %p363_p2 = pnand %p1365_p0, %p362_p1 }
   0x5   : > { %p404_p3 = scmp.lt.s32.totalorder (!%p363_p2), %s1361_s22, 1  ;;  %vm420_vm0 = vcmask (!%p363_p2), 261120   ;;  %vm427_vm1 = vcmask (!%p363_p2), 253952   ;;  %v1531_v21 = vld [vmem:[%s1883_s3] sm:$0xff] (!%p363_p2)   ;;  %v1532_v22 = vld [vmem:[%s1883_s3 + $0x8] sm:$0xff] (!%p363_p2)   ;;  %s1597_s17 = smov (!%p363_p2), 96  }
   0x6   : > { %366 = sbr.rel (%p363_p2) target bundleno = 3141 (0xc45), region = 68  ;;  %1437 = vmatprep.subr.bf16.mxu0 (!%p363_p2), %v1531_v21  ;;  %v1368_v34 = vld [vmem:[%s1881_s1] ss:$0 sm:$0xff] (!%p363_p2)  ;;  %vm560_vm2 = vcmask (!%p363_p2), 130048   ;;  %vm621_vm3 = vcmask (!%p363_p2), 138240   ;;  %vm628_vm4 = vcmask (!%p363_p2), 131072  }
   0x7   : > { %1438 = vmatpush3.bf16.msra.mxu0 (!%p363_p2), %v1531_v21  ;;  %v1369_v40 = vld [vmem:[%s1882_s2] ss:$0 sm:$0xff] (!%p363_p2)  ;;  %s1598_s18 = smov (!%p363_p2), 64   ;;  %s1599_s19 = smov (!%p363_p2), 112   ;;  %vm669_vm5 = vcmask (!%p363_p2), 1040384   ;;  %vm1245_vm9 = vcmask (!%p363_p2), 523264  }
   0x8   : > { %1439 = vmatprep.subr.bf16.mxu0 (!%p363_p2), %v1532_v22  ;;  %s1600_s20 = smov (!%p363_p2), 80   ;;  %s1602_s24 = smov (!%p363_p2), 48  }
   0x9   : > { %s1603_s29 = smov (!%p363_p2), 16  }
   0xb   : > { %1440 = vmatpush3.bf16.msra.mxu0 (!%p363_p2), %v1532_v22 }
   0xd   : > { %s1894_s22 = smov (!%p404_p3, %s1361_s22), 1 }
   0xe   : > { %s1509_s23 = smul.u32 24, %s1894_s22 }
  0x10   : > { %s408_s26 = scalar_lea.vmem %s1880_s0, %s1509_s23 }
  0x11   : > { %v1686_v0 = vld [vmem:[%s408_s26] sm:$0xff]  ;;  %v1688_v1 = vld [vmem:[%s408_s26 + $0x10] sm:$0x1]  ;;  %v1690_v2 = vld [vmem:[%s408_s26 + $0x8] sm:$0xff] }
  0x12   : > { %v421_v3 = vsel %vm420_vm0, %v1686_v0, 0.0  ;;  %v428_v4 = vsel %vm427_vm1, %v1688_v1, 0.0  ;;  %v424_v5 = vsel %vm420_vm0, %v1690_v2, 0.0 }
  0x13   : > { %422 = vadd.xlane.f32.xlu0 %v421_v3  ;;  %429 = vadd.xlane.f32.xlu1 %v428_v4 }
  0x17   : > { %425 = vadd.xlane.f32.xlu0 %v424_v5 }
  0xa0   : > { %v423_v6 = vpop.xlane.xlu0 %422  ;;  %v430_v7 = vpop.xlane.xlu1 %429 }
  0xa1   : > { %v432_v8 = vmul.f32 0.03125, %v423_v6  ;;  %v434_v9 = vmul.f32 0.03125, %v430_v7 }
  0xa3   : > { %v435_v10 = vsub.f32 %v1686_v0, %v432_v8  ;;  %v437_v11 = vsub.f32 %v1688_v1, %v434_v9 }
  0xa4   : > { %v426_v12 = vpop.xlane.xlu0 %425 }
  0xa5   : > { %v433_v13 = vmul.f32 0.03125, %v426_v12  ;;  %v438_v14 = vmul.f32 %v435_v10, %v435_v10  ;;  %v440_v15 = vmul.f32 %v437_v11, %v437_v11 }
  0xa7   : > { %v436_v16 = vsub.f32 %v1690_v2, %v433_v13  ;;  %v441_v17 = vsel %vm420_vm0, %v438_v14, 0.0  ;;  %v447_v18 = vsel %vm427_vm1, %v440_v15, 0.0 }
  0xa8   : > { %442 = vadd.xlane.f32.xlu1 %v441_v17 }
  0xa9   : > { %v439_v19 = vmul.f32 %v436_v16, %v436_v16 }
  0xab   : > { %v444_v20 = vsel %vm420_vm0, %v439_v19, 0.0 }
  0xac   : > { %448 = vadd.xlane.f32.xlu1 %v447_v18  ;;  %445 = vadd.xlane.f32.xlu0 %v444_v20 }
 0x135   : > { %v443_v23 = vpop.xlane.xlu1 %442 }
 0x136   : > { %v450_v24 = vmul.f32 0.03125, %v443_v23  ;;  %v1601_v23 = vmov 0  }
 0x138   : > { %v453_v25 = vadd.f32 1e-05, %v450_v24  ;;  %v1744_v24 = vsel %vm669_vm5, 65535, %v1601_v23 }
 0x139   : > { %v449_v26 = vpop.xlane.xlu1 %448  ;;  %v446_v27 = vpop.xlane.xlu0 %445 }
 0x13a   : > { %1541 = vrsqrt.f32 %v453_v25  ;;  %v452_v28 = vmul.f32 0.03125, %v449_v26  ;;  %v451_v29 = vmul.f32 0.03125, %v446_v27 }
 0x13c   : > { %v455_v30 = vadd.f32 1e-05, %v452_v28  ;;  %v454_v31 = vadd.f32 1e-05, %v451_v29 }
 0x13e   : > { %1543 = vrsqrt.f32 %v455_v30 }
 0x13f   : > { %1545 = vrsqrt.f32 %v454_v31 }
 0x144   : > { %v1542_v32 = vpop.eup %1541 }
 0x145   : > { %v459_v33 = vmul.f32 %v1542_v32, %v435_v10 }
 0x147   : > { %v468_v39 = vmul.f32 %v1368_v34, %v459_v33 }
 0x148   : > { %v1544_v35 = vpop.eup %1543 }
 0x149   : > { %v1546_v36 = vpop.eup %1545  ;;  %v461_v37 = vmul.f32 %v1544_v35, %v437_v11  ;;  %v477_v44 = vadd.f32 %v1369_v40, %v468_v39 }
 0x14a   : > { %v460_v38 = vmul.f32 %v1546_v36, %v436_v16 }
 0x14b   : > { %v470_v41 = vmul.f32 %v1368_v34, %v461_v37 }
 0x14c   : > { %v469_v42 = vmul.f32 %v1368_v34, %v460_v38 }
 0x14d   : > { %v479_v43 = vadd.f32 %v1369_v40, %v470_v41 }
 0x14e   : > { %v478_v45 = vadd.f32 %v1369_v40, %v469_v42 }
 0x14f   : > { %v481_v46 = vpack.c.bf16 %v479_v43, %v479_v43 }
 0x150   : > { %v480_v47 = vpack.c.bf16 %v478_v45, %v477_v44 }
 0x152   : > { %1441 = vmatprep.mubr.msk.bf16.mxu0 %vm420_vm0, %v480_v47 }
 0x153   : > { %1442 = vmatmul.mubr.msk.bf16.vlgmr.msra.gmra.mrb[0].mxu0 %vm420_vm0, %v481_v46 }
 0x226   : > { %v1443_v48 = vpop.f32.mrb[0].mxu0 }
 0x227   : > { %v1718_v49 = vpack.c.bf16 %v1443_v48, %v1443_v48  ;;  %v538_v50 = vpop.f32.mrb[1].mxu0 }
 0x228   : > { %v1444_v51 = vpop.f32.mrb[2].mxu0 }
 0x229   : > { %558 = vrot.lane.b32.xlu1 %v1718_v49, %s1597_s17  ;;  %v541_v52 = vpop.f32.mrb[3].mxu0 }
 0x22a   : > { %v1721_v53 = vpack.c.bf16 %v541_v52, %v538_v50 }
 0x22c   : > { %556 = vrot.lane.b32.xlu0 %v1721_v53, %s1597_s17  ;;  %1449 = vmatprep.mubr.msk.bf16.mxu1 %vm560_vm2, %v1721_v53 }
 0x29b   : > { %v559_v56 = vpop.permute.xlu1 %558 }
 0x29c   : > { %v571_v57 = vsel %vm560_vm2, %v559_v56, 0 }
 0x29e   : > { %v557_v54 = vpop.permute.xlu0 %556 }
 0x29f   : > { %1505 = vmatprep.subr.msk.bf16.mxu1 %vm560_vm2, %v557_v54  ;;  %v568_v55 = vsel %vm560_vm2, %v557_v54, 0 }
 0x2a0   : > { %1446 = vmatpush3.bf16.xpose.msra.mxu1 %v568_v55 }
 0x2a1   : > { %1506 = vmatprep.subr.msk.bf16.mxu1 %vm560_vm2, %v559_v56 }
 0x2a8   : > { %1448 = vmatpush3.bf16.xpose.msra.mxu1 %v571_v57 }
 0x2af   : > { %1450 = vmatmul.mubr.msk.bf16.vlgmr.msra.gmra.mrb[0].mxu1 %vm560_vm2, %v1718_v49 }
 0x382   : > { %v1451_v58 = vpop.f32.mrb[0].mxu1 }
 0x383   : > { %v607_v59 = vpop.f32.mrb[1].mxu1  ;;  %v629_v3 = vsel %vm628_vm4, %v1451_v58, -inf }
 0x384   : > { %v1452_v60 = vpop.f32.mrb[2].mxu1  ;;  %v622_v61 = vsel %vm621_vm3, %v607_v59, -inf }
 0x385   : > { %623 = vmax.xlane.f32.xlu1 %v622_v61  ;;  %v610_v62 = vpop.f32.mrb[3].mxu1 }
 0x386   : > { %v625_v63 = vsel %vm621_vm3, %v610_v62, -inf }
 0x387   : > { %626 = vmax.xlane.f32.xlu0 %v625_v63 }
 0x38b   : > { %630 = vmax.xlane.f32.xlu0 %v629_v3 }
 0x412   : > { %v624_v4 = vpop.xlane.xlu1 %623 }
 0x413   : > { %v632_v7 = vsub.f32 %v607_v59, %v624_v4 }
 0x414   : > { %v627_v5 = vpop.xlane.xlu0 %626 }
 0x415   : > { %v633_v6 = vsub.f32 %v610_v62, %v627_v5  ;;  %v635_v11 = vmul.f32 1.442695, %v632_v7 }
 0x417   : > { %v637_v8 = vmul.f32 1.442695, %v633_v6 }
 0x418   : > { %v631_v9 = vpop.xlane.xlu0 %630 }
 0x419   : > { %1547 = vpow2.f32 %v637_v8  ;;  %v634_v10 = vsub.f32 %v1451_v58, %v631_v9 }
 0x41b   : > { %v639_v12 = vmul.f32 1.442695, %v634_v10 }
 0x41d   : > { %1549 = vpow2.f32 %v639_v12 }
 0x41e   : > { %1551 = vpow2.f32 %v635_v11 }
 0x423   : > { %v1548_v13 = vpop.eup %1547 }
 0x424   : > { %v644_v14 = vsel %vm621_vm3, %v1548_v13, 0.0 }
 0x425   : > { %645 = vadd.xlane.f32.xlu0 %v644_v14 }
 0x427   : > { %v1550_v15 = vpop.eup %1549 }
 0x428   : > { %v647_v16 = vsel %vm628_vm4, %v1550_v15, 0.0  ;;  %v1552_v17 = vpop.eup %1551 }
 0x429   : > { %648 = vadd.xlane.f32.xlu1 %v647_v16  ;;  %v641_v18 = vsel %vm621_vm3, %v1552_v17, 0.0 }
 0x42d   : > { %642 = vadd.xlane.f32.xlu1 %v641_v18 }
 0x43b   : > { %658 = vrot.lane.b32.xlu0 %v1721_v53, %s1598_s18 }
 0x43e   : > { %660 = vrot.lane.b32.xlu1 %v1718_v49, %s1598_s18 }
 0x43f   : > { %723 = vrot.lane.b32.xlu0 %v1721_v53, %s1599_s19 }
 0x442   : > { %727 = vrot.lane.b32.xlu1 %v1721_v53, %s1600_s20 }
 0x446   : > { %729 = vrot.lane.b32.xlu1 %v1718_v49, %s1600_s20 }
 0x44a   : > { %725 = vrot.lane.b32.xlu1 %v1718_v49, %s1599_s19 }
 0x4b2   : > { %v646_v19 = vpop.xlane.xlu0 %645 }
 0x4b6   : > { %v649_v20 = vpop.xlane.xlu1 %648  ;;  %v659_v21 = vpop.permute.xlu0 %658 }
 0x4b7   : > { %1453 = vmatprep.subr.bf16.mxu0 %v659_v21  ;;  %1553 = vrcp.f32 %v649_v20  ;;  %v1533_v20 = vld [vmem:[%s1884_s4] sm:$0xff]  }
 0x4b8   : > { %1454 = vmatpush3.bf16.msra.mxu0 %v659_v21  ;;  %1555 = vrcp.f32 %v646_v19  ;;  %v1534_v21 = vld [vmem:[%s1884_s4 + $0x8] sm:$0xff]  }
 0x4ba   : > { %v643_v22 = vpop.xlane.xlu1 %642  ;;  %v724_v36 = vpop.permute.xlu0 %723 }
 0x4bb   : > { %1557 = vrcp.f32 %v643_v22 }
 0x4be   : > { %v661_v25 = vpop.permute.xlu1 %660 }
 0x4bf   : > { %v673_v26 = vand.u32 %v1744_v24, %v661_v25 }
 0x4c1   : > { %1455 = vmatprep.subr.bf16.mxu0 %v673_v26  ;;  %v1554_v27 = vpop.eup %1553 }
 0x4c2   : > { %v728_v28 = vpop.permute.xlu1 %727  ;;  %1456 = vmatpush3.bf16.msra.mxu0 %v673_v26  ;;  %v1556_v29 = vpop.eup %1555  ;;  %v655_v31 = vmul.f32 %v1554_v27, %v1550_v15 }
 0x4c3   : > { %1507 = vmatprep.subr.msk.bf16.mxu0 %vm560_vm2, %v728_v28  ;;  %v654_v33 = vmul.f32 %v1556_v29, %v1548_v13  ;;  %v738_v37 = vsel %vm560_vm2, %v728_v28, 0 }
 0x4c4   : > { %v657_v35 = vpack.c.bf16 %v655_v31, %v655_v31 }
 0x4c5   : > { %v1558_v30 = vpop.eup %1557 }
 0x4c6   : > { %v653_v32 = vmul.f32 %v1558_v30, %v1552_v17  ;;  %v730_v38 = vpop.permute.xlu1 %729 }
 0x4c7   : > { %v741_v39 = vsel %vm560_vm2, %v730_v38, 0 }
 0x4c8   : > { %v656_v34 = vpack.c.bf16 %v654_v33, %v653_v32 }
 0x4ca   : > { %1457 = vmatprep.mubr.msk.bf16.mxu0 %vm621_vm3, %v656_v34  ;;  %v726_v40 = vpop.permute.xlu1 %725 }
 0x4cb   : > { %1458 = vmatmul.mubr.msk.bf16.vlgmr.msra.gmra.mrb[4].mxu0 %vm621_vm3, %v657_v35 }
 0x4cc   : > { %1462 = vmatpush3.bf16.xpose.msra.mxu0 %v738_v37  ;;  %1465 = vmatprep.mubr.msk.bf16.mxu0 %vm560_vm2, %v724_v36  ;;  %v1382_v36 = vld [vmem:[%s1885_s5] ss:$0 sm:$0xff] }
 0x4cd   : > { %1508 = vmatprep.subr.msk.bf16.mxu0 %vm560_vm2, %v730_v38 }
 0x4d4   : > { %1464 = vmatpush3.bf16.xpose.msra.mxu0 %v741_v39 }
 0x4db   : > { %1466 = vmatmul.mubr.msk.bf16.vlgmr.msra.gmra.mrb[8].mxu0 %vm560_vm2, %v726_v40 }
 0x59e   : > { %v1755_v41 = vpop.f32.mrb[4].mxu0 }
 0x59f   : > { %v1757_v42 = vpop.f32.mrb[5].mxu0 }
 0x5a0   : > { %v1460_v43 = vpop.f32.mrb[6].mxu0 }
 0x5a1   : > { %v1759_v44 = vpop.f32.mrb[7].mxu0 }
 0x5ae   : > { %v1467_v45 = vpop.f32.mrb[8].mxu0 }
 0x5af   : > { %v777_v46 = vpop.f32.mrb[9].mxu0  ;;  %v797_v52 = vsel %vm628_vm4, %v1467_v45, -inf }
 0x5b0   : > { %v1468_v47 = vpop.f32.mrb[10].mxu0  ;;  %v791_v48 = vsel %vm621_vm3, %v777_v46, -inf }
 0x5b1   : > { %792 = vmax.xlane.f32.xlu0 %v791_v48  ;;  %v780_v50 = vpop.f32.mrb[11].mxu0 }
 0x5b2   : > { %v794_v51 = vsel %vm621_vm3, %v780_v50, -inf }
 0x5b3   : > { %795 = vmax.xlane.f32.xlu1 %v794_v51 }
 0x5b5   : > { %798 = vmax.xlane.f32.xlu0 %v797_v52 }
 0x63e   : > { %v793_v54 = vpop.xlane.xlu0 %792 }
 0x63f   : > { %v800_v55 = vsub.f32 %v777_v46, %v793_v54 }
 0x640   : > { %v796_v56 = vpop.xlane.xlu1 %795 }
 0x641   : > { %v803_v57 = vmul.f32 1.442695, %v800_v55  ;;  %v801_v58 = vsub.f32 %v780_v50, %v796_v56 }
 0x642   : > { %v799_v59 = vpop.xlane.xlu0 %798 }
 0x643   : > { %1559 = vpow2.f32 %v803_v57  ;;  %v805_v60 = vmul.f32 1.442695, %v801_v58  ;;  %v802_v61 = vsub.f32 %v1467_v45, %v799_v59 }
 0x645   : > { %1561 = vpow2.f32 %v805_v60  ;;  %v807_v62 = vmul.f32 1.442695, %v802_v61 }
 0x647   : > { %1563 = vpow2.f32 %v807_v62 }
 0x64d   : > { %v1560_v63 = vpop.eup %1559 }
 0x64e   : > { %v809_v3 = vsel %vm621_vm3, %v1560_v63, 0.0 }
 0x64f   : > { %v1562_v4 = vpop.eup %1561  ;;  %810 = vadd.xlane.f32.xlu0 %v809_v3  ;;  %v1535_v3 = vld [vmem:[%s1888_s8] sm:$0xff]  }
 0x650   : > { %v812_v7 = vsel %vm621_vm3, %v1562_v4, 0.0  ;;  %1485 = vmatprep.subr.bf16.mxu0 %v1535_v3 }
 0x651   : > { %v1564_v5 = vpop.eup %1563  ;;  %1486 = vmatpush3.bf16.msra.mxu0 %v1535_v3 }
 0x652   : > { %v815_v6 = vsel %vm628_vm4, %v1564_v5, 0.0 }
 0x653   : > { %816 = vadd.xlane.f32.xlu1 %v815_v6  ;;  %813 = vadd.xlane.f32.xlu0 %v812_v7 }
 0x664   : > { %828 = vrot.lane.b32.xlu1 %v1718_v49, %s1602_s24 }
 0x669   : > { %826 = vrot.lane.b32.xlu0 %v1721_v53, %s1602_s24  ;;  %s413_s24 = scalar_lea.vmem %s1892_s12, %s1509_s23 }
 0x6dc   : > { %v811_v8 = vpop.xlane.xlu0 %810 }
 0x6dd   : > { %1565 = vrcp.f32 %v811_v8 }
 0x6e0   : > { %v814_v9 = vpop.xlane.xlu0 %813  ;;  %v817_v10 = vpop.xlane.xlu1 %816 }
 0x6e1   : > { %1567 = vrcp.f32 %v814_v9 }
 0x6e2   : > { %1569 = vrcp.f32 %v817_v10 }
 0x6e4   : > { %v827_v11 = vpop.permute.xlu0 %826  ;;  %v829_v12 = vpop.permute.xlu1 %828 }
 0x6e5   : > { %v838_v13 = vand.u32 %v829_v12, %v1744_v24  ;;  %1469 = vmatprep.subr.bf16.mxu1 %v827_v11 }
 0x6e6   : > { %1470 = vmatpush3.bf16.msra.mxu1 %v827_v11 }
 0x6e7   : > { %1471 = vmatprep.subr.bf16.mxu1 %v838_v13  ;;  %v1566_v14 = vpop.eup %1565 }
 0x6e8   : > { %v821_v49 = vmul.f32 %v1566_v14, %v1560_v63 }
 0x6ea   : > { %1472 = vmatpush3.bf16.msra.mxu1 %v838_v13 }
 0x6eb   : > { %v1568_v15 = vpop.eup %1567  ;;  %1477 = vmatprep.subr.bf16.mxu1 %v1533_v20 }
 0x6ec   : > { %v1570_v16 = vpop.eup %1569  ;;  %v822_v17 = vmul.f32 %v1568_v15, %v1562_v4  ;;  %v1536_v4 = vld [vmem:[%s1888_s8 + $0x8] sm:$0xff]  }
 0x6ed   : > { %v823_v53 = vmul.f32 %v1570_v16, %v1564_v5  ;;  %1487 = vmatprep.subr.bf16.mxu0 %v1536_v4  ;;  %v1387_v16 = vld [vmem:[%s1886_s6] ss:$0 sm:$0xff] }
 0x6ee   : > { %v824_v18 = vpack.c.bf16 %v822_v17, %v821_v49  ;;  %1488 = vmatpush3.bf16.msra.mxu0 %v1536_v4 }
 0x6ef   : > { %v825_v19 = vpack.c.bf16 %v823_v53, %v823_v53 }
 0x6f0   : > { %1473 = vmatprep.mubr.msk.bf16.mxu1 %vm621_vm3, %v824_v18 }
 0x6f1   : > { %1474 = vmatmul.mubr.msk.bf16.vlgmr.msra.gmra.mrb[4].mxu1 %vm621_vm3, %v825_v19 }
 0x6f2   : > { %1478 = vmatpush3.bf16.msra.mxu1 %v1533_v20 }
 0x6f3   : > { %1479 = vmatprep.subr.bf16.mxu1 %v1534_v21 }
 0x6f6   : > { %1480 = vmatpush3.bf16.msra.mxu1 %v1534_v21  ;;  %v1388_v21 = vld [vmem:[%s1887_s7] ss:$0 sm:$0xff] }
 0x7c4   : > { %v1475_v22 = vpop.f32.mrb[4].mxu1 }
 0x7c5   : > { %v874_v23 = vpop.f32.mrb[5].mxu1 }
 0x7c6   : > { %v1476_v24 = vpop.f32.mrb[6].mxu1 }
 0x7c7   : > { %v877_v25 = vpop.f32.mrb[7].mxu1 }
 0x7c8   : > { %v1526_v26 = vpack.i.bf16 %v877_v25, %v874_v23 }
 0x7ca   : > { %1527 = vrot.lane.b32.xlu1 %v1526_v26, %s1603_s29 }
 0x7ce   : > { %895 = vrot.lane.b32.xlu1 %v1475_v22, %s1603_s29 }
 0x83c   : > { %v1528_v27 = vpop.permute.xlu1 %1527 }
 0x83d   : > { %v1530_v28 = vunpack.i.h.bf16 %v1528_v27  ;;  %v1529_v29 = vunpack.i.l.bf16 %v1528_v27 }
 0x83f   : > { %v901_v30 = vsel %vm560_vm2, %v1759_v44, %v1530_v28  ;;  %v900_v31 = vsel %vm560_vm2, %v1757_v42, %v1529_v29  ;;  %v1537_v28 = vld [vmem:[%s1890_s10] sm:$0xff]   ;;  %v1538_v29 = vld [vmem:[%s1890_s10 + $0x8] sm:$0xff]  }
 0x840   : > { %v903_v32 = vpack.c.bf16 %v901_v30, %v900_v31  ;;  %v896_v33 = vpop.permute.xlu1 %895  ;;  %1493 = vmatprep.subr.bf16.mxu1 %v1537_v28  ;;  %v1539_v30 = vld [vmem:[%s1890_s10 + $0x10] sm:$0xff]   ;;  %v1540_v31 = vld [vmem:[%s1890_s10 + $0x18] sm:$0xff]  }
 0x841   : > { %v902_v34 = vsel %vm560_vm2, %v1755_v41, %v896_v33 }
 0x842   : > { %v904_v35 = vpack.c.bf16 %v902_v34, %v902_v34  ;;  %1481 = vmatprep.mubr.msk.bf16.mxu1 %vm420_vm0, %v903_v32  ;;  %v1389_v32 = vld [vmem:[%s1889_s9] ss:$0 sm:$0xff] }
 0x844   : > { %1482 = vmatmul.mubr.msk.bf16.vlgmr.msra.gmra.mrb[8].mxu1 %vm420_vm0, %v904_v35 }
 0x845   : > { %1494 = vmatpush3.bf16.msra.mxu1 %v1537_v28 }
 0x846   : > { %1495 = vmatprep.subr.bf16.mxu1 %v1538_v29 }
 0x849   : > { %1496 = vmatpush3.bf16.msra.mxu1 %v1538_v29 }
 0x84a   : > { %1497 = vmatprep.subr.bf16.mxu1 %v1539_v30 }
 0x84d   : > { %1498 = vmatpush3.bf16.msra.mxu1 %v1539_v30 }
 0x84e   : > { %1499 = vmatprep.subr.bf16.mxu1 %v1540_v31 }
 0x851   : > { %1500 = vmatpush3.bf16.msra.mxu1 %v1540_v31 }
 0x917   : > { %v1483_v37 = vpop.f32.mrb[8].mxu1 }
 0x918   : > { %v968_v38 = vpop.f32.mrb[9].mxu1  ;;  %v977_v39 = vadd.f32 %v1483_v37, %v1382_v36 }
 0x919   : > { %v969_v40 = vadd.f32 %v1382_v36, %v968_v38  ;;  %v1484_v43 = vpop.f32.mrb[10].mxu1 }
 0x91a   : > { %v971_v42 = vpop.f32.mrb[11].mxu1  ;;  %v1793_v41 = vadd.f32 %v977_v39, %v1688_v1 }
 0x91b   : > { %v1790_v44 = vadd.f32 %v969_v40, %v1686_v0  ;;  %v972_v45 = vadd.f32 %v1382_v36, %v971_v42 }
 0x91c   : > { %v993_v50 = vsel %vm427_vm1, %v1793_v41, 0.0 }
 0x91d   : > { %v1796_v46 = vadd.f32 %v972_v45, %v1690_v2  ;;  %v987_v47 = vsel %vm420_vm0, %v1790_v44, 0.0 }
 0x91e   : > { %988 = vadd.xlane.f32.xlu0 %v987_v47 }
 0x91f   : > { %v990_v48 = vsel %vm420_vm0, %v1796_v46, 0.0 }
 0x920   : > { %991 = vadd.xlane.f32.xlu1 %v990_v48 }
 0x922   : > { %994 = vadd.xlane.f32.xlu0 %v993_v50 }
 0x9ab   : > { %v989_v0 = vpop.xlane.xlu0 %988 }
 0x9ac   : > { %v996_v51 = vmul.f32 0.03125, %v989_v0 }
 0x9ad   : > { %v992_v52 = vpop.xlane.xlu1 %991 }
 0x9ae   : > { %v999_v1 = vsub.f32 %v1790_v44, %v996_v51  ;;  %v997_v54 = vmul.f32 0.03125, %v992_v52 }
 0x9af   : > { %v995_v2 = vpop.xlane.xlu0 %994 }
 0x9b0   : > { %v1000_v55 = vsub.f32 %v1796_v46, %v997_v54  ;;  %v998_v56 = vmul.f32 0.03125, %v995_v2  ;;  %v1002_v57 = vmul.f32 %v999_v1, %v999_v1 }
 0x9b2   : > { %v1001_v58 = vsub.f32 %v1793_v41, %v998_v56  ;;  %v1005_v59 = vsel %vm420_vm0, %v1002_v57, 0.0  ;;  %v1003_v60 = vmul.f32 %v1000_v55, %v1000_v55 }
 0x9b3   : > { %1006 = vadd.xlane.f32.xlu0 %v1005_v59 }
 0x9b4   : > { %v1004_v61 = vmul.f32 %v1001_v58, %v1001_v58  ;;  %v1008_v62 = vsel %vm420_vm0, %v1003_v60, 0.0 }
 0x9b6   : > { %v1011_v63 = vsel %vm427_vm1, %v1004_v61, 0.0 }
 0x9b7   : > { %1009 = vadd.xlane.f32.xlu0 %v1008_v62  ;;  %1012 = vadd.xlane.f32.xlu1 %v1011_v63 }
 0xa40   : > { %v1007_v5 = vpop.xlane.xlu0 %1006 }
 0xa41   : > { %v1014_v6 = vmul.f32 0.03125, %v1007_v5 }
 0xa43   : > { %v1017_v7 = vadd.f32 1e-05, %v1014_v6 }
 0xa44   : > { %v1013_v8 = vpop.xlane.xlu1 %1012  ;;  %v1010_v9 = vpop.xlane.xlu0 %1009 }
 0xa45   : > { %1571 = vrsqrt.f32 %v1017_v7  ;;  %v1016_v10 = vmul.f32 0.03125, %v1013_v8  ;;  %v1015_v11 = vmul.f32 0.03125, %v1010_v9 }
 0xa47   : > { %v1019_v12 = vadd.f32 1e-05, %v1016_v10  ;;  %v1018_v13 = vadd.f32 1e-05, %v1015_v11 }
 0xa49   : > { %1573 = vrsqrt.f32 %v1019_v12 }
 0xa4a   : > { %1575 = vrsqrt.f32 %v1018_v13 }
 0xa4f   : > { %v1572_v14 = vpop.eup %1571 }
 0xa50   : > { %v1023_v15 = vmul.f32 %v1572_v14, %v999_v1 }
 0xa52   : > { %v1032_v19 = vmul.f32 %v1387_v16, %v1023_v15 }
 0xa53   : > { %v1574_v49 = vpop.eup %1573 }
 0xa54   : > { %v1576_v17 = vpop.eup %1575  ;;  %v1025_v53 = vmul.f32 %v1574_v49, %v1001_v58  ;;  %v1041_v24 = vadd.f32 %v1388_v21, %v1032_v19 }
 0xa55   : > { %v1024_v18 = vmul.f32 %v1576_v17, %v1000_v55 }
 0xa56   : > { %v1034_v20 = vmul.f32 %v1387_v16, %v1025_v53 }
 0xa57   : > { %v1033_v22 = vmul.f32 %v1387_v16, %v1024_v18 }
 0xa58   : > { %v1043_v23 = vadd.f32 %v1388_v21, %v1034_v20 }
 0xa59   : > { %v1042_v25 = vadd.f32 %v1388_v21, %v1033_v22 }
 0xa5a   : > { %v1045_v26 = vpack.c.bf16 %v1043_v23, %v1043_v23 }
 0xa5b   : > { %v1044_v27 = vpack.c.bf16 %v1042_v25, %v1041_v24 }
 0xa5d   : > { %1489 = vmatprep.mubr.msk.bf16.mxu0 %vm420_vm0, %v1044_v27 }
 0xa5e   : > { %1490 = vmatmul.mubr.msk.bf16.vlgmr.msra.gmra.mrb[12].mxu0 %vm420_vm0, %v1045_v26 }
 0xb31   : > { %v1491_v33 = vpop.f32.mrb[12].mxu0 }
 0xb32   : > { %v1839_v34 = vadd.f32 %v1491_v33, %v1389_v32  ;;  %v1109_v35 = vpop.f32.mrb[13].mxu0 }
 0xb33   : > { %v1841_v36 = vadd.f32 %v1389_v32, %v1109_v35  ;;  %v1492_v37 = vpop.f32.mrb[14].mxu0 }
 0xb34   : > { %v1844_v38 = vmul.f32 0.70710677, %v1839_v34  ;;  %v1112_v39 = vpop.f32.mrb[15].mxu0 }
 0xb35   : > { %v1847_v40 = vmul.f32 0.70710677, %v1841_v36  ;;  %v1849_v43 = vadd.f32 %v1389_v32, %v1112_v39  ;;  %v1604_v39 = vmov -1.0  }
 0xb36   : > { %v1137_v42 = vand.u32 2147483647, %v1844_v38  ;;  %vm1131_vm6 = vcmp.ge.f32.partialorder %v1844_v38, 0.0 }
 0xb37   : > { %v1135_v45 = vand.u32 2147483647, %v1847_v40  ;;  %v1854_v48 = vmul.f32 0.70710677, %v1849_v43  ;;  %vm1129_vm7 = vcmp.ge.f32.partialorder %v1847_v40, 0.0  ;;  %v1125_v40 = vmul.f32 0.5, %v1839_v34 }
 0xb38   : > { %v1140_v47 = vmul.f32 0.3275911, %v1137_v42  ;;  %v1179_v2 = vsub.f32 0.0, %v1137_v42 }
 0xb39   : > { %v1138_v50 = vmul.f32 0.3275911, %v1135_v45  ;;  %v1136_v51 = vand.u32 2147483647, %v1854_v48  ;;  %v1177_v55 = vsub.f32 0.0, %v1135_v45  ;;  %vm1130_vm8 = vcmp.ge.f32.partialorder %v1854_v48, 0.0 }
 0xb3a   : > { %v1143_v0 = vadd.f32 1.0, %v1140_v47  ;;  %v1182_v57 = vmul.f32 %v1179_v2, %v1137_v42  ;;  %v1134_v42 = vsel %vm1131_vm6, 1.0, %v1604_v39  ;;  %v1133_v38 = vsel %vm1130_vm8, 1.0, %v1604_v39 }
 0xb3b   : > { %v1141_v52 = vadd.f32 1.0, %v1138_v50  ;;  %v1139_v1 = vmul.f32 0.3275911, %v1136_v51  ;;  %v1178_v58 = vsub.f32 0.0, %v1136_v51  ;;  %v1180_v61 = vmul.f32 %v1177_v55, %v1135_v45 }
 0xb3c   : > { %1577 = vrcp.f32 %v1143_v0  ;;  %v1187_v4 = vmul.f32 1.442695, %v1182_v57  ;;  %v1132_v50 = vsel %vm1129_vm7, 1.0, %v1604_v39  ;;  %v1123_v55 = vmul.f32 0.5, %v1841_v36 }
 0xb3d   : > { %1579 = vrcp.f32 %v1141_v52  ;;  %v1142_v54 = vadd.f32 1.0, %v1139_v1  ;;  %v1181_v6 = vmul.f32 %v1178_v58, %v1136_v51  ;;  %v1183_v8 = vmul.f32 1.442695, %v1180_v61 }
 0xb3f   : > { %1581 = vrcp.f32 %v1142_v54  ;;  %v1185_v14 = vmul.f32 1.442695, %v1181_v6 }
 0xb40   : > { %1583 = vpow2.f32 %v1187_v4 }
 0xb41   : > { %1585 = vpow2.f32 %v1183_v8 }
 0xb42   : > { %1587 = vpow2.f32 %v1185_v14 }
 0xb46   : > { %v1578_v56 = vpop.eup %1577 }
 0xb47   : > { %v1580_v59 = vpop.eup %1579  ;;  %v1152_v60 = vmul.f32 1.0614054, %v1578_v56 }
 0xb48   : > { %v1150_v62 = vmul.f32 1.0614054, %v1580_v59 }
 0xb49   : > { %v1155_v63 = vadd.f32 -1.4531521, %v1152_v60  ;;  %v1582_v3 = vpop.eup %1581 }
 0xb4a   : > { %v1153_v5 = vadd.f32 -1.4531521, %v1150_v62  ;;  %v1151_v9 = vmul.f32 1.0614054, %v1582_v3  ;;  %v1584_v27 = vpop.eup %1583  ;;  %v1394_v62 = vld [vmem:[%s1891_s11] ss:$0 sm:$0xff] }
 0xb4b   : > { %v1158_v7 = vmul.f32 %v1578_v56, %v1155_v63  ;;  %v1586_v29 = vpop.eup %1585 }
 0xb4c   : > { %v1156_v10 = vmul.f32 %v1580_v59, %v1153_v5  ;;  %v1154_v12 = vadd.f32 -1.4531521, %v1151_v9  ;;  %v1588_v37 = vpop.eup %1587 }
 0xb4d   : > { %v1161_v11 = vadd.f32 1.4214138, %v1158_v7 }
 0xb4e   : > { %v1159_v13 = vadd.f32 1.4214138, %v1156_v10  ;;  %v1157_v16 = vmul.f32 %v1582_v3, %v1154_v12 }
 0xb4f   : > { %v1164_v15 = vmul.f32 %v1578_v56, %v1161_v11 }
 0xb50   : > { %v1162_v49 = vmul.f32 %v1580_v59, %v1159_v13  ;;  %v1160_v53 = vadd.f32 1.4214138, %v1157_v16 }
 0xb51   : > { %v1167_v17 = vadd.f32 -0.28449672, %v1164_v15 }
 0xb52   : > { %v1165_v18 = vadd.f32 -0.28449672, %v1162_v49  ;;  %v1163_v20 = vmul.f32 %v1582_v3, %v1160_v53 }
 0xb53   : > { %v1170_v19 = vmul.f32 %v1578_v56, %v1167_v17 }
 0xb54   : > { %v1168_v21 = vmul.f32 %v1580_v59, %v1165_v18  ;;  %v1166_v23 = vadd.f32 -0.28449672, %v1163_v20 }
 0xb55   : > { %v1173_v22 = vadd.f32 0.2548296, %v1170_v19 }
 0xb56   : > { %v1171_v24 = vadd.f32 0.2548296, %v1168_v21  ;;  %v1169_v26 = vmul.f32 %v1582_v3, %v1166_v23 }
 0xb57   : > { %v1176_v25 = vmul.f32 %v1578_v56, %v1173_v22  ;;  %v1124_v56 = vmul.f32 0.5, %v1849_v43 }
 0xb58   : > { %v1174_v28 = vmul.f32 %v1580_v59, %v1171_v24  ;;  %v1172_v31 = vadd.f32 0.2548296, %v1169_v26 }
 0xb59   : > { %v1191_v30 = vmul.f32 %v1584_v27, %v1176_v25 }
 0xb5a   : > { %v1189_v32 = vmul.f32 %v1586_v29, %v1174_v28  ;;  %v1175_v35 = vmul.f32 %v1582_v3, %v1172_v31 }
 0xb5b   : > { %v1194_v33 = vsub.f32 1.0, %v1191_v30 }
 0xb5c   : > { %v1192_v45 = vsub.f32 1.0, %v1189_v32  ;;  %v1190_v0 = vmul.f32 %v1588_v37, %v1175_v35 }
 0xb5d   : > { %v1197_v47 = vmul.f32 %v1194_v33, %v1134_v42 }
 0xb5e   : > { %v1195_v51 = vmul.f32 %v1192_v45, %v1132_v50  ;;  %v1193_v52 = vsub.f32 1.0, %v1190_v0 }
 0xb5f   : > { %v1200_v1 = vadd.f32 1.0, %v1197_v47 }
 0xb60   : > { %v1198_v54 = vadd.f32 1.0, %v1195_v51  ;;  %v1196_v2 = vmul.f32 %v1193_v52, %v1133_v38 }
 0xb61   : > { %v1203_v58 = vmul.f32 %v1200_v1, %v1125_v40 }
 0xb62   : > { %v1199_v57 = vadd.f32 1.0, %v1196_v2  ;;  %v1201_v59 = vmul.f32 %v1198_v54, %v1123_v55 }
 0xb63   : > { %v1205_v61 = vpack.c.bf16 %v1203_v58, %v1203_v58 }
 0xb64   : > { %v1202_v60 = vmul.f32 %v1199_v57, %v1124_v56 }
 0xb66   : > { %v1204_v48 = vpack.c.bf16 %v1202_v60, %v1201_v59 }
 0xb68   : > { %1501 = vmatprep.mubr.msk.bf16.mxu1 %vm1245_vm9, %v1204_v48 }
 0xb69   : > { %1502 = vmatmul.mubr.msk.bf16.vlgmr.msra.gmra.mrb[12].mxu1 %vm1245_vm9, %v1205_v61 }
 0xc3c   : > { %v1503_v63 = vpop.f32.mrb[12].mxu1 }
 0xc3d   : > { %v1295_v34 = vadd.f32 %v1503_v63, %v1394_v62  ;;  %v1286_v3 = vpop.f32.mrb[13].mxu1 }
 0xc3e   : > { %v1287_v36 = vadd.f32 %v1394_v62, %v1286_v3  ;;  %v1504_v43 = vpop.f32.mrb[14].mxu1 }
 0xc3f   : > { %v1302_v4 = vadd.f32 %v1295_v34, %v1793_v41  ;;  %v1289_v5 = vpop.f32.mrb[15].mxu1 }
 0xc40   : > { %v1300_v6 = vadd.f32 %v1287_v36, %v1790_v44  ;;  %v1290_v7 = vadd.f32 %v1394_v62, %v1289_v5 }
 0xc41   : > { %1305 = vst.msk [vmem:[%s413_s24 + $0x10] sm:$0x1] %vm427_vm1, %v1302_v4 }
 0xc42   : > { %1303 = vst.msk [vmem:[%s413_s24] sm:$0xff] %vm420_vm0, %v1300_v6  ;;  %v1301_v8 = vadd.f32 %v1290_v7, %v1796_v46 }
 0xc44   : > { %1304 = vst.msk [vmem:[%s413_s24 + $0x8] sm:$0xff] %vm420_vm0, %v1301_v8 }
 0xc45 PF: > { %s22_s21 = sadd.s32 1, %s1595_s21  }
 0xc46   : > { %p19_p4 = scmp.ge.s32.totalorder %s22_s21, 4  }
 0xc48   :  { %21 = sbr.rel (!%p19_p4) target bundleno = 1 (0x1), region = 98 }

</bundles_post_ra>
